<compile_context>
chip_gen: v6e
topology: v6e:2x2x1
jax: 0.10.0
libtpu: 0.0.40
codegen_flags: <defaults>
</compile_context>

<pallas_src>
import jax
import jax.numpy as jnp
from jax.experimental import pallas as pl
from jax.experimental.pallas import tpu as pltpu

LATENT = 2
IN_DIM = 784
BIAS_PACK_W = 896  # multiple of 128 >= widest bias (784)

# (fan_in, fan_out) per layer, PyTorch module order
_LAYER_SHAPES = [
    (784, 256), (256, 128), (128, 64), (64, 16),          # fc1..fc4
    (16, 2), (16, 2),                                      # fc_mu, fc_logvar
    (2, 16), (16, 64), (64, 128), (128, 256), (256, 784),  # fc5..fc9
]


def _vae_kernel(
    x_ref, eps_ref, bias_ref,
    w1, w2, w3, w4, wml, w5, w6, w7, w8, w9,
    recon_ref, mulv_ref,
):
    f32 = jnp.float32
    bf16 = jnp.bfloat16

    bias = bias_ref[...]  # [10, 896] f32, VMEM-resident

    def mm(h_bf16, w_ref, row, width):
        # bf16 x bf16 MXU matmul, f32 accumulation, f32 bias add
        acc = jnp.dot(h_bf16, w_ref[...], preferred_element_type=f32)
        return acc + bias[row:row + 1, 0:width]

    def relu_bf(v):
        return jnp.maximum(v, 0.0).astype(bf16)

    # x arrives as f32; cast to bf16 on the VPU here (saves a wrapper-side
    # HBM round-trip for a bf16 copy of the input).
    x = x_ref[...].astype(bf16)                     # [TB, 784] bf16

    # ---- encode ----
    h1 = relu_bf(mm(x, w1, 0, 256))
    h2 = relu_bf(mm(h1, w2, 1, 128))
    h3 = relu_bf(mm(h2, w3, 2, 64))
    h4 = relu_bf(mm(h3, w4, 3, 16))
    mulv = mm(h4, wml, 4, 4)                        # [TB, 4] f32 = mu | logvar
    mu = mulv[:, 0:2]
    logvar = mulv[:, 2:4]

    # ---- reparameterize (f32 on VPU/EUP) ----
    std = jnp.exp(0.5 * logvar)
    z = mu + eps_ref[...] * std                     # [TB, 2] f32

    # ---- decode ----
    # K=2 layer on the VPU: two broadcast FMAs instead of an MXU push.
    w5v = w5[...].astype(f32)                       # [2, 16]
    h5 = z[:, 0:1] * w5v[0:1, :] + z[:, 1:2] * w5v[1:2, :] + bias[5:6, 0:16]
    h5 = relu_bf(h5)
    h6 = relu_bf(mm(h5, w6, 6, 64))
    h7 = relu_bf(mm(h6, w7, 7, 128))
    h8 = relu_bf(mm(h7, w8, 8, 256))
    h9 = mm(h8, w9, 9, 784)                         # [TB, 784] f32

    # sigmoid via tanh identity: a single EUP op instead of exp + reciprocal.
    recon = 0.5 * (jnp.tanh(0.5 * h9) + 1.0)

    recon_ref[...] = recon.astype(recon_ref.dtype)
    mulv_ref[...] = mulv.astype(mulv_ref.dtype)


def init_params(key):
    """Deterministic init mimicking nn.Linear default (U[-1/sqrt(fan_in), +])."""
    params = []
    for (fan_in, fan_out) in _LAYER_SHAPES:
        key, kw, kb = jax.random.split(key, 3)
        bound = 1.0 / jnp.sqrt(float(fan_in))
        w = jax.random.uniform(kw, (fan_in, fan_out), jnp.float32, -bound, bound)
        b = jax.random.uniform(kb, (1, fan_out), jnp.float32, -bound, bound)
        params.append((w, b))
    return params


def _prepare_params(params):
    """Fuse fc_mu|fc_logvar, cast weights to bf16, pack biases into one array."""
    (w1, b1), (w2, b2), (w3, b3), (w4, b4) = params[0:4]
    (wmu, bmu), (wlv, blv) = params[4:6]
    (w5, b5), (w6, b6), (w7, b7), (w8, b8), (w9, b9) = params[6:11]

    wml = jnp.concatenate([wmu, wlv], axis=1)       # [16, 4]
    bml = jnp.concatenate([bmu, blv], axis=1)       # [1, 4]

    weights = [w1, w2, w3, w4, wml, w5, w6, w7, w8, w9]
    biases = [b1, b2, b3, b4, bml, b5, b6, b7, b8, b9]

    weights_bf16 = [w.astype(jnp.bfloat16) for w in weights]

    bias_pack = jnp.zeros((len(biases), BIAS_PACK_W), jnp.float32)
    for i, b in enumerate(biases):
        bias_pack = bias_pack.at[i, : b.shape[-1]].set(b.reshape(-1))
    return weights_bf16, bias_pack


def _device_caps():
    """Pick batch tile ceiling + VMEM limit from the chip's VMEM capacity."""
    try:
        vmem_cap = pltpu.get_tpu_info().vmem_capacity_bytes
    except Exception:
        vmem_cap = 64 << 20                     # conservative (v7x per-TC)
    block_b = 1024 if vmem_cap >= (96 << 20) else 512   # v5e/v6e vs v7x
    vmem_limit = min(vmem_cap // 2, 64 << 20)            # 64 MiB / 32 MiB
    return block_b, vmem_limit


def _choose_tile(B, block_b):
    """Batch tile: multiple of 16 (bf16 packing), <= B, and >= 2 grid steps
    whenever the batch is large enough (so both v7x TensorCores get work)."""
    if B <= 16:
        return B                                # single full-batch block
    tb = min(block_b, (B // 16) * 16)
    if pl.cdiv(B, tb) < 2:                      # would be a 1-step grid
        tb = max(16, ((B // 2) // 16) * 16)     # split batch across >=2 steps
    return tb


def vae_forward(x_img, eps, params, block_b=None, recon_dtype=jnp.float32):
    """x_img: [B, 1, 28, 28] (NCHW); eps: [B, 2] reparameterization noise.

    Set recon_dtype=jnp.bfloat16 on v5e to halve the recon HBM store traffic
    (costs ~4e-3 abs error near sigmoid saturation)."""
    B = x_img.shape[0]
    x = x_img.reshape(B, IN_DIM)                # x.view(-1, 784); stays f32
    eps_f = eps.astype(jnp.float32)

    default_block_b, vmem_limit = _device_caps()
    tb = _choose_tile(B, block_b if block_b is not None else default_block_b)
    grid = (pl.cdiv(B, tb),)                    # boundary block masked by Pallas

    weights_bf16, bias_pack = _prepare_params(params)

    # weights / bias pack: constant index_map -> VMEM-resident across grid steps
    w_specs = [pl.BlockSpec(w.shape, lambda i: (0, 0)) for w in weights_bf16]
    bias_spec = pl.BlockSpec(bias_pack.shape, lambda i: (0, 0))

    recon, mulv = pl.pallas_call(
        _vae_kernel,
        out_shape=(
            jax.ShapeDtypeStruct((B, IN_DIM), recon_dtype),       # recon_x
            jax.ShapeDtypeStruct((B, 2 * LATENT), jnp.float32),   # mu | logvar
        ),
        grid=grid,
        in_specs=[
            pl.BlockSpec((tb, IN_DIM), lambda i: (i, 0)),      # x tile (f32)
            pl.BlockSpec((tb, LATENT), lambda i: (i, 0)),      # eps tile
            bias_spec,
        ] + w_specs,
        out_specs=(
            pl.BlockSpec((tb, IN_DIM), lambda i: (i, 0)),
            pl.BlockSpec((tb, 2 * LATENT), lambda i: (i, 0)),
        ),
        compiler_params=pltpu.CompilerParams(
            dimension_semantics=("parallel",),
            vmem_limit_bytes=vmem_limit,
        ),
    )(x, eps_f, bias_pack, *weights_bf16)

    mu = mulv[:, 0:LATENT]
    logvar = mulv[:, LATENT:2 * LATENT]
    return recon, mu, logvar


def _reference_forward(x_img, eps, params):
    """Pure-JAX reference mirroring the kernel's bf16-matmul / f32-elementwise math."""
    B = x_img.shape[0]
    bf16 = jnp.bfloat16
    relu = lambda v: jnp.maximum(v, 0.0)

    def mm(h, w, b):
        return jnp.dot(h.astype(bf16), w.astype(bf16),
                       preferred_element_type=jnp.float32) + b

    (w1, b1), (w2, b2), (w3, b3), (w4, b4) = params[0:4]
    (wmu, bmu), (wlv, blv) = params[4:6]
    (w5, b5), (w6, b6), (w7, b7), (w8, b8), (w9, b9) = params[6:11]

    h = x_img.reshape(B, IN_DIM).astype(bf16)
    h = relu(mm(h, w1, b1))
    h = relu(mm(h, w2, b2))
    h = relu(mm(h, w3, b3))
    h = relu(mm(h, w4, b4))
    mu = mm(h, wmu, bmu)
    logvar = mm(h, wlv, blv)
    z = mu + eps * jnp.exp(0.5 * logvar)
    h = relu(z @ w5.astype(bf16).astype(jnp.float32) + b5)  # f32 VPU-style layer
    h = relu(mm(h, w6, b6))
    h = relu(mm(h, w7, b7))
    h = relu(mm(h, w8, b8))
    recon = jax.nn.sigmoid(mm(h, w9, b9))
    return recon, mu, logvar


if __name__ == "__main__":
    key = jax.random.PRNGKey(0)
    k_params, k_x, k_eps = jax.random.split(key, 3)

    B = 8
    x_img = jax.random.uniform(k_x, (B, 1, 28, 28), jnp.float32)   # NCHW input
    eps = jax.random.normal(k_eps, (B, LATENT), jnp.float32)       # randn_like noise

    params = init_params(k_params)

    recon, mu, logvar = jax.block_until_ready(
        jax.jit(vae_forward)(x_img, eps, params)
    )

    r_ref, mu_ref, lv_ref = _reference_forward(x_img, eps, params)
    assert recon.shape == (B, IN_DIM) and mu.shape == (B, LATENT) and logvar.shape == (B, LATENT)
    assert jnp.allclose(recon, r_ref, atol=2e-3, rtol=2e-3)
    assert jnp.allclose(mu, mu_ref, atol=2e-3, rtol=2e-3)
    assert jnp.allclose(logvar, lv_ref, atol=2e-3, rtol=2e-3)

    print("KERNEL_OK")
</pallas_src>

<mosaic_0001>
module attributes {stable_mosaic.version = 11 : i64} {
  func.func @_vae_kernel(%arg0: i32, %arg1: memref<8x784xf32, #tpu.memory_space<vmem>>, %arg2: memref<8x2xf32, #tpu.memory_space<vmem>>, %arg3: memref<10x896xf32, #tpu.memory_space<vmem>>, %arg4: memref<784x256xbf16, #tpu.memory_space<vmem>>, %arg5: memref<256x128xbf16, #tpu.memory_space<vmem>>, %arg6: memref<128x64xbf16, #tpu.memory_space<vmem>>, %arg7: memref<64x16xbf16, #tpu.memory_space<vmem>>, %arg8: memref<16x4xbf16, #tpu.memory_space<vmem>>, %arg9: memref<2x16xbf16, #tpu.memory_space<vmem>>, %arg10: memref<16x64xbf16, #tpu.memory_space<vmem>>, %arg11: memref<64x128xbf16, #tpu.memory_space<vmem>>, %arg12: memref<128x256xbf16, #tpu.memory_space<vmem>>, %arg13: memref<256x784xbf16, #tpu.memory_space<vmem>>, %arg14: memref<8x784xf32, #tpu.memory_space<vmem>>, %arg15: memref<8x4xf32, #tpu.memory_space<vmem>>) attributes {dimension_semantics = [#tpu.dimension_semantics<parallel>], iteration_bounds = array<i64: 1>, scalar_prefetch = 0 : i64, scratch_operands = 0 : i64, tpu.core_type = #tpu.core_type<tc>, window_params = [{transform_indices = @transform_0, window_bounds = array<i64: 8, 784>}, {transform_indices = @transform_1, window_bounds = array<i64: 8, 2>}, {pipeline_mode = #tpu.pipeline_mode<synchronous>, transform_indices = @transform_2, window_bounds = array<i64: 10, 896>}, {pipeline_mode = #tpu.pipeline_mode<synchronous>, transform_indices = @transform_3, window_bounds = array<i64: 784, 256>}, {pipeline_mode = #tpu.pipeline_mode<synchronous>, transform_indices = @transform_4, window_bounds = array<i64: 256, 128>}, {pipeline_mode = #tpu.pipeline_mode<synchronous>, transform_indices = @transform_5, window_bounds = array<i64: 128, 64>}, {pipeline_mode = #tpu.pipeline_mode<synchronous>, transform_indices = @transform_6, window_bounds = array<i64: 64, 16>}, {pipeline_mode = #tpu.pipeline_mode<synchronous>, transform_indices = @transform_7, window_bounds = array<i64: 16, 4>}, {pipeline_mode = #tpu.pipeline_mode<synchronous>, transform_indices = @transform_8, window_bounds = array<i64: 2, 16>}, {pipeline_mode = #tpu.pipeline_mode<synchronous>, transform_indices = @transform_9, window_bounds = array<i64: 16, 64>}, {pipeline_mode = #tpu.pipeline_mode<synchronous>, transform_indices = @transform_10, window_bounds = array<i64: 64, 128>}, {pipeline_mode = #tpu.pipeline_mode<synchronous>, transform_indices = @transform_11, window_bounds = array<i64: 128, 256>}, {pipeline_mode = #tpu.pipeline_mode<synchronous>, transform_indices = @transform_12, window_bounds = array<i64: 256, 784>}, {transform_indices = @transform_13, window_bounds = array<i64: 8, 784>}, {transform_indices = @transform_14, window_bounds = array<i64: 8, 4>}]} {
    %c0 = arith.constant 0 : index
    %c0_0 = arith.constant 0 : index
    %0 = vector.load %arg3[%c0, %c0_0] : memref<10x896xf32, #tpu.memory_space<vmem>>, vector<10x896xf32>
    %c0_1 = arith.constant 0 : index
    %c0_2 = arith.constant 0 : index
    %1 = vector.load %arg1[%c0_1, %c0_2] : memref<8x784xf32, #tpu.memory_space<vmem>>, vector<8x784xf32>
    %2 = arith.truncf %1 : vector<8x784xf32> to vector<8x784xbf16>
    %c0_3 = arith.constant 0 : index
    %c0_4 = arith.constant 0 : index
    %3 = vector.load %arg4[%c0_3, %c0_4] : memref<784x256xbf16, #tpu.memory_space<vmem>>, vector<784x256xbf16>
    %cst = arith.constant dense<0.000000e+00> : vector<8x256xf32>
    %4 = tpu.matmul %2, %3, %cst {dimension_numbers = #tpu.dot_dimension_numbers<[1], [0], [0], [1], [0, 0, 1, 1], [], []>} : vector<8x784xbf16>, vector<784x256xbf16>, vector<8x256xf32> -> vector<8x256xf32>
    %5 = vector.extract_strided_slice %0 {offsets = [0, 0], sizes = [1, 256], strides = [1, 1]} : vector<10x896xf32> to vector<1x256xf32>
    %6 = vector.broadcast %5 : vector<1x256xf32> to vector<8x256xf32>
    %7 = arith.addf %4, %6 : vector<8x256xf32>
    %cst_5 = arith.constant 0.000000e+00 : f32
    %8 = vector.broadcast %cst_5 : f32 to vector<8x256xf32>
    %9 = arith.maximumf %7, %8 : vector<8x256xf32>
    %10 = arith.truncf %9 : vector<8x256xf32> to vector<8x256xbf16>
    %c0_6 = arith.constant 0 : index
    %c0_7 = arith.constant 0 : index
    %11 = vector.load %arg5[%c0_6, %c0_7] : memref<256x128xbf16, #tpu.memory_space<vmem>>, vector<256x128xbf16>
    %cst_8 = arith.constant dense<0.000000e+00> : vector<8x128xf32>
    %12 = tpu.matmul %10, %11, %cst_8 {dimension_numbers = #tpu.dot_dimension_numbers<[1], [0], [0], [1], [0, 0, 1, 1], [], []>} : vector<8x256xbf16>, vector<256x128xbf16>, vector<8x128xf32> -> vector<8x128xf32>
    %13 = vector.extract_strided_slice %0 {offsets = [1, 0], sizes = [1, 128], strides = [1, 1]} : vector<10x896xf32> to vector<1x128xf32>
    %14 = vector.broadcast %13 : vector<1x128xf32> to vector<8x128xf32>
    %15 = arith.addf %12, %14 : vector<8x128xf32>
    %cst_9 = arith.constant 0.000000e+00 : f32
    %16 = vector.broadcast %cst_9 : f32 to vector<8x128xf32>
    %17 = arith.maximumf %15, %16 : vector<8x128xf32>
    %18 = arith.truncf %17 : vector<8x128xf32> to vector<8x128xbf16>
    %c0_10 = arith.constant 0 : index
    %c0_11 = arith.constant 0 : index
    %19 = vector.load %arg6[%c0_10, %c0_11] : memref<128x64xbf16, #tpu.memory_space<vmem>>, vector<128x64xbf16>
    %cst_12 = arith.constant dense<0.000000e+00> : vector<8x64xf32>
    %20 = tpu.matmul %18, %19, %cst_12 {dimension_numbers = #tpu.dot_dimension_numbers<[1], [0], [0], [1], [0, 0, 1, 1], [], []>} : vector<8x128xbf16>, vector<128x64xbf16>, vector<8x64xf32> -> vector<8x64xf32>
    %21 = vector.extract_strided_slice %0 {offsets = [2, 0], sizes = [1, 64], strides = [1, 1]} : vector<10x896xf32> to vector<1x64xf32>
    %22 = vector.broadcast %21 : vector<1x64xf32> to vector<8x64xf32>
    %23 = arith.addf %20, %22 : vector<8x64xf32>
    %cst_13 = arith.constant 0.000000e+00 : f32
    %24 = vector.broadcast %cst_13 : f32 to vector<8x64xf32>
    %25 = arith.maximumf %23, %24 : vector<8x64xf32>
    %26 = arith.truncf %25 : vector<8x64xf32> to vector<8x64xbf16>
    %c0_14 = arith.constant 0 : index
    %c0_15 = arith.constant 0 : index
    %27 = vector.load %arg7[%c0_14, %c0_15] : memref<64x16xbf16, #tpu.memory_space<vmem>>, vector<64x16xbf16>
    %cst_16 = arith.constant dense<0.000000e+00> : vector<8x16xf32>
    %28 = tpu.matmul %26, %27, %cst_16 {dimension_numbers = #tpu.dot_dimension_numbers<[1], [0], [0], [1], [0, 0, 1, 1], [], []>} : vector<8x64xbf16>, vector<64x16xbf16>, vector<8x16xf32> -> vector<8x16xf32>
    %29 = vector.extract_strided_slice %0 {offsets = [3, 0], sizes = [1, 16], strides = [1, 1]} : vector<10x896xf32> to vector<1x16xf32>
    %30 = vector.broadcast %29 : vector<1x16xf32> to vector<8x16xf32>
    %31 = arith.addf %28, %30 : vector<8x16xf32>
    %cst_17 = arith.constant 0.000000e+00 : f32
    %32 = vector.broadcast %cst_17 : f32 to vector<8x16xf32>
    %33 = arith.maximumf %31, %32 : vector<8x16xf32>
    %34 = arith.truncf %33 : vector<8x16xf32> to vector<8x16xbf16>
    %c0_18 = arith.constant 0 : index
    %c0_19 = arith.constant 0 : index
    %35 = vector.load %arg8[%c0_18, %c0_19] : memref<16x4xbf16, #tpu.memory_space<vmem>>, vector<16x4xbf16>
    %cst_20 = arith.constant dense<0.000000e+00> : vector<8x4xf32>
    %36 = tpu.matmul %34, %35, %cst_20 {dimension_numbers = #tpu.dot_dimension_numbers<[1], [0], [0], [1], [0, 0, 1, 1], [], []>} : vector<8x16xbf16>, vector<16x4xbf16>, vector<8x4xf32> -> vector<8x4xf32>
    %37 = vector.extract_strided_slice %0 {offsets = [4, 0], sizes = [1, 4], strides = [1, 1]} : vector<10x896xf32> to vector<1x4xf32>
    %38 = vector.broadcast %37 : vector<1x4xf32> to vector<8x4xf32>
    %39 = arith.addf %36, %38 : vector<8x4xf32>
    %40 = vector.extract_strided_slice %39 {offsets = [0, 0], sizes = [8, 2], strides = [1, 1]} : vector<8x4xf32> to vector<8x2xf32>
    %41 = vector.extract_strided_slice %39 {offsets = [0, 2], sizes = [8, 2], strides = [1, 1]} : vector<8x4xf32> to vector<8x2xf32>
    %cst_21 = arith.constant 5.000000e-01 : f32
    %42 = vector.broadcast %cst_21 : f32 to vector<8x2xf32>
    %43 = arith.mulf %42, %41 : vector<8x2xf32>
    %44 = math.exp %43 : vector<8x2xf32>
    %c0_22 = arith.constant 0 : index
    %c0_23 = arith.constant 0 : index
    %45 = vector.load %arg2[%c0_22, %c0_23] : memref<8x2xf32, #tpu.memory_space<vmem>>, vector<8x2xf32>
    %46 = arith.mulf %45, %44 : vector<8x2xf32>
    %47 = arith.addf %40, %46 : vector<8x2xf32>
    %c0_24 = arith.constant 0 : index
    %c0_25 = arith.constant 0 : index
    %48 = vector.load %arg9[%c0_24, %c0_25] : memref<2x16xbf16, #tpu.memory_space<vmem>>, vector<2x16xbf16>
    %49 = arith.extf %48 : vector<2x16xbf16> to vector<2x16xf32>
    %50 = vector.extract_strided_slice %47 {offsets = [0, 0], sizes = [8, 1], strides = [1, 1]} : vector<8x2xf32> to vector<8x1xf32>
    %51 = vector.extract_strided_slice %49 {offsets = [0, 0], sizes = [1, 16], strides = [1, 1]} : vector<2x16xf32> to vector<1x16xf32>
    %52 = vector.broadcast %50 : vector<8x1xf32> to vector<8x16xf32>
    %53 = vector.broadcast %51 : vector<1x16xf32> to vector<8x16xf32>
    %54 = arith.mulf %52, %53 : vector<8x16xf32>
    %55 = vector.extract_strided_slice %47 {offsets = [0, 1], sizes = [8, 1], strides = [1, 1]} : vector<8x2xf32> to vector<8x1xf32>
    %56 = vector.extract_strided_slice %49 {offsets = [1, 0], sizes = [1, 16], strides = [1, 1]} : vector<2x16xf32> to vector<1x16xf32>
    %57 = vector.broadcast %55 : vector<8x1xf32> to vector<8x16xf32>
    %58 = vector.broadcast %56 : vector<1x16xf32> to vector<8x16xf32>
    %59 = arith.mulf %57, %58 : vector<8x16xf32>
    %60 = arith.addf %54, %59 : vector<8x16xf32>
    %61 = vector.extract_strided_slice %0 {offsets = [5, 0], sizes = [1, 16], strides = [1, 1]} : vector<10x896xf32> to vector<1x16xf32>
    %62 = vector.broadcast %61 : vector<1x16xf32> to vector<8x16xf32>
    %63 = arith.addf %60, %62 : vector<8x16xf32>
    %cst_26 = arith.constant 0.000000e+00 : f32
    %64 = vector.broadcast %cst_26 : f32 to vector<8x16xf32>
    %65 = arith.maximumf %63, %64 : vector<8x16xf32>
    %66 = arith.truncf %65 : vector<8x16xf32> to vector<8x16xbf16>
    %c0_27 = arith.constant 0 : index
    %c0_28 = arith.constant 0 : index
    %67 = vector.load %arg10[%c0_27, %c0_28] : memref<16x64xbf16, #tpu.memory_space<vmem>>, vector<16x64xbf16>
    %cst_29 = arith.constant dense<0.000000e+00> : vector<8x64xf32>
    %68 = tpu.matmul %66, %67, %cst_29 {dimension_numbers = #tpu.dot_dimension_numbers<[1], [0], [0], [1], [0, 0, 1, 1], [], []>} : vector<8x16xbf16>, vector<16x64xbf16>, vector<8x64xf32> -> vector<8x64xf32>
    %69 = vector.extract_strided_slice %0 {offsets = [6, 0], sizes = [1, 64], strides = [1, 1]} : vector<10x896xf32> to vector<1x64xf32>
    %70 = vector.broadcast %69 : vector<1x64xf32> to vector<8x64xf32>
    %71 = arith.addf %68, %70 : vector<8x64xf32>
    %cst_30 = arith.constant 0.000000e+00 : f32
    %72 = vector.broadcast %cst_30 : f32 to vector<8x64xf32>
    %73 = arith.maximumf %71, %72 : vector<8x64xf32>
    %74 = arith.truncf %73 : vector<8x64xf32> to vector<8x64xbf16>
    %c0_31 = arith.constant 0 : index
    %c0_32 = arith.constant 0 : index
    %75 = vector.load %arg11[%c0_31, %c0_32] : memref<64x128xbf16, #tpu.memory_space<vmem>>, vector<64x128xbf16>
    %cst_33 = arith.constant dense<0.000000e+00> : vector<8x128xf32>
    %76 = tpu.matmul %74, %75, %cst_33 {dimension_numbers = #tpu.dot_dimension_numbers<[1], [0], [0], [1], [0, 0, 1, 1], [], []>} : vector<8x64xbf16>, vector<64x128xbf16>, vector<8x128xf32> -> vector<8x128xf32>
    %77 = vector.extract_strided_slice %0 {offsets = [7, 0], sizes = [1, 128], strides = [1, 1]} : vector<10x896xf32> to vector<1x128xf32>
    %78 = vector.broadcast %77 : vector<1x128xf32> to vector<8x128xf32>
    %79 = arith.addf %76, %78 : vector<8x128xf32>
    %cst_34 = arith.constant 0.000000e+00 : f32
    %80 = vector.broadcast %cst_34 : f32 to vector<8x128xf32>
    %81 = arith.maximumf %79, %80 : vector<8x128xf32>
    %82 = arith.truncf %81 : vector<8x128xf32> to vector<8x128xbf16>
    %c0_35 = arith.constant 0 : index
    %c0_36 = arith.constant 0 : index
    %83 = vector.load %arg12[%c0_35, %c0_36] : memref<128x256xbf16, #tpu.memory_space<vmem>>, vector<128x256xbf16>
    %cst_37 = arith.constant dense<0.000000e+00> : vector<8x256xf32>
    %84 = tpu.matmul %82, %83, %cst_37 {dimension_numbers = #tpu.dot_dimension_numbers<[1], [0], [0], [1], [0, 0, 1, 1], [], []>} : vector<8x128xbf16>, vector<128x256xbf16>, vector<8x256xf32> -> vector<8x256xf32>
    %85 = vector.extract_strided_slice %0 {offsets = [8, 0], sizes = [1, 256], strides = [1, 1]} : vector<10x896xf32> to vector<1x256xf32>
    %86 = vector.broadcast %85 : vector<1x256xf32> to vector<8x256xf32>
    %87 = arith.addf %84, %86 : vector<8x256xf32>
    %cst_38 = arith.constant 0.000000e+00 : f32
    %88 = vector.broadcast %cst_38 : f32 to vector<8x256xf32>
    %89 = arith.maximumf %87, %88 : vector<8x256xf32>
    %90 = arith.truncf %89 : vector<8x256xf32> to vector<8x256xbf16>
    %c0_39 = arith.constant 0 : index
    %c0_40 = arith.constant 0 : index
    %91 = vector.load %arg13[%c0_39, %c0_40] : memref<256x784xbf16, #tpu.memory_space<vmem>>, vector<256x784xbf16>
    %cst_41 = arith.constant dense<0.000000e+00> : vector<8x784xf32>
    %92 = tpu.matmul %90, %91, %cst_41 {dimension_numbers = #tpu.dot_dimension_numbers<[1], [0], [0], [1], [0, 0, 1, 1], [], []>} : vector<8x256xbf16>, vector<256x784xbf16>, vector<8x784xf32> -> vector<8x784xf32>
    %93 = vector.extract_strided_slice %0 {offsets = [9, 0], sizes = [1, 784], strides = [1, 1]} : vector<10x896xf32> to vector<1x784xf32>
    %94 = vector.broadcast %93 : vector<1x784xf32> to vector<8x784xf32>
    %95 = arith.addf %92, %94 : vector<8x784xf32>
    %cst_42 = arith.constant 5.000000e-01 : f32
    %96 = vector.broadcast %cst_42 : f32 to vector<8x784xf32>
    %97 = arith.mulf %96, %95 : vector<8x784xf32>
    %98 = math.tanh %97 : vector<8x784xf32>
    %cst_43 = arith.constant 1.000000e+00 : f32
    %99 = vector.broadcast %cst_43 : f32 to vector<8x784xf32>
    %100 = arith.addf %98, %99 : vector<8x784xf32>
    %cst_44 = arith.constant 5.000000e-01 : f32
    %101 = vector.broadcast %cst_44 : f32 to vector<8x784xf32>
    %102 = arith.mulf %101, %100 : vector<8x784xf32>
    %c0_45 = arith.constant 0 : index
    %c0_46 = arith.constant 0 : index
    %103 = vector.load %arg14[%c0_45, %c0_46] : memref<8x784xf32, #tpu.memory_space<vmem>>, vector<8x784xf32>
    tpu.vector_store %arg14[%c0_45, %c0_46], %102 {strides = array<i32>} : memref<8x784xf32, #tpu.memory_space<vmem>>, vector<8x784xf32>,
    %c0_47 = arith.constant 0 : index
    %c0_48 = arith.constant 0 : index
    %104 = vector.load %arg15[%c0_47, %c0_48] : memref<8x4xf32, #tpu.memory_space<vmem>>, vector<8x4xf32>
    tpu.vector_store %arg15[%c0_47, %c0_48], %39 {strides = array<i32>} : memref<8x4xf32, #tpu.memory_space<vmem>>, vector<8x4xf32>,
    return
  }
  func.func @transform_0(%arg0: i32) -> (i32, i32) {
    %c0_i32 = arith.constant 0 : i32
    %c0_i32_0 = arith.constant 0 : i32
    return %arg0, %c0_i32 : i32, i32
  }
  func.func @transform_1(%arg0: i32) -> (i32, i32) {
    %c0_i32 = arith.constant 0 : i32
    %c0_i32_0 = arith.constant 0 : i32
    return %arg0, %c0_i32 : i32, i32
  }
  func.func @transform_2(%arg0: i32) -> (i32, i32) {
    %c0_i32 = arith.constant 0 : i32
    %c0_i32_0 = arith.constant 0 : i32
    %c0_i32_1 = arith.constant 0 : i32
    return %c0_i32, %c0_i32_0 : i32, i32
  }
  func.func @transform_3(%arg0: i32) -> (i32, i32) {
    %c0_i32 = arith.constant 0 : i32
    %c0_i32_0 = arith.constant 0 : i32
    %c0_i32_1 = arith.constant 0 : i32
    return %c0_i32, %c0_i32_0 : i32, i32
  }
  func.func @transform_4(%arg0: i32) -> (i32, i32) {
    %c0_i32 = arith.constant 0 : i32
    %c0_i32_0 = arith.constant 0 : i32
    %c0_i32_1 = arith.constant 0 : i32
    return %c0_i32, %c0_i32_0 : i32, i32
  }
  func.func @transform_5(%arg0: i32) -> (i32, i32) {
    %c0_i32 = arith.constant 0 : i32
    %c0_i32_0 = arith.constant 0 : i32
    %c0_i32_1 = arith.constant 0 : i32
    return %c0_i32, %c0_i32_0 : i32, i32
  }
  func.func @transform_6(%arg0: i32) -> (i32, i32) {
    %c0_i32 = arith.constant 0 : i32
    %c0_i32_0 = arith.constant 0 : i32
    %c0_i32_1 = arith.constant 0 : i32
    return %c0_i32, %c0_i32_0 : i32, i32
  }
  func.func @transform_7(%arg0: i32) -> (i32, i32) {
    %c0_i32 = arith.constant 0 : i32
    %c0_i32_0 = arith.constant 0 : i32
    %c0_i32_1 = arith.constant 0 : i32
    return %c0_i32, %c0_i32_0 : i32, i32
  }
  func.func @transform_8(%arg0: i32) -> (i32, i32) {
    %c0_i32 = arith.constant 0 : i32
    %c0_i32_0 = arith.constant 0 : i32
    %c0_i32_1 = arith.constant 0 : i32
    return %c0_i32, %c0_i32_0 : i32, i32
  }
  func.func @transform_9(%arg0: i32) -> (i32, i32) {
    %c0_i32 = arith.constant 0 : i32
    %c0_i32_0 = arith.constant 0 : i32
    %c0_i32_1 = arith.constant 0 : i32
    return %c0_i32, %c0_i32_0 : i32, i32
  }
  func.func @transform_10(%arg0: i32) -> (i32, i32) {
    %c0_i32 = arith.constant 0 : i32
    %c0_i32_0 = arith.constant 0 : i32
    %c0_i32_1 = arith.constant 0 : i32
    return %c0_i32, %c0_i32_0 : i32, i32
  }
  func.func @transform_11(%arg0: i32) -> (i32, i32) {
    %c0_i32 = arith.constant 0 : i32
    %c0_i32_0 = arith.constant 0 : i32
    %c0_i32_1 = arith.constant 0 : i32
    return %c0_i32, %c0_i32_0 : i32, i32
  }
  func.func @transform_12(%arg0: i32) -> (i32, i32) {
    %c0_i32 = arith.constant 0 : i32
    %c0_i32_0 = arith.constant 0 : i32
    %c0_i32_1 = arith.constant 0 : i32
    return %c0_i32, %c0_i32_0 : i32, i32
  }
  func.func @transform_13(%arg0: i32) -> (i32, i32) {
    %c0_i32 = arith.constant 0 : i32
    %c0_i32_0 = arith.constant 0 : i32
    return %arg0, %c0_i32 : i32, i32
  }
  func.func @transform_14(%arg0: i32) -> (i32, i32) {
    %c0_i32 = arith.constant 0 : i32
    %c0_i32_0 = arith.constant 0 : i32
    return %arg0, %c0_i32 : i32, i32
  }
}

</mosaic_0001>

<bundles_post_ra>
// kernel: vae_forward.1
= control target key start
LH: loop header
LB: loop body
LE: loop exit
PB: predicated region body
PF: predicated region fallthrough
CT: control target
= control target key end

     0   :  { %v3336_v2 = vmov 0   ;;  %vm667_vm0 = vcmask 130048   ;;  %s4346_s0 = inlined_call_operand.vmem [shape: f32[8,784], index: 0, kind: input, shape index: {}]   ;;  %s4347_s1 = inlined_call_operand.vmem [shape: f32[8,2], index: 1, kind: input, shape index: {}]   ;;  %s4348_s2 = inlined_call_operand.vmem [shape: f32[10,896], index: 2, kind: input, shape index: {}]   ;;  %s4349_s3 = inlined_call_operand.vmem [shape: bf16[784,256], index: 3, kind: input, shape index: {}]   ;;  %s4350_s4 = inlined_call_operand.vmem [shape: bf16[256,128], index: 4, kind: input, shape index: {}]   ;;  %s4351_s5 = inlined_call_operand.vmem [shape: bf16[128,64], index: 5, kind: input, shape index: {}]   ;;  %s4352_s6 = inlined_call_operand.vmem [shape: bf16[64,16], index: 6, kind: input, shape index: {}]   ;;  %s4353_s7 = inlined_call_operand.vmem [shape: bf16[16,4], index: 7, kind: input, shape index: {}]   ;;  %s4354_s8 = inlined_call_operand.vmem [shape: bf16[2,16], index: 8, kind: input, shape index: {}]   ;;  %s4355_s9 = inlined_call_operand.vmem [shape: bf16[16,64], index: 9, kind: input, shape index: {}]   ;;  %s4356_s10 = inlined_call_operand.vmem [shape: bf16[64,128], index: 10, kind: input, shape index: {}]   ;;  %s4357_s11 = inlined_call_operand.vmem [shape: bf16[128,256], index: 11, kind: input, shape index: {}]   ;;  %s4358_s12 = inlined_call_operand.vmem [shape: bf16[256,784], index: 12, kind: input, shape index: {}]   ;;  %s4359_s13 = inlined_call_operand.hbm [shape: f32[8,784], index: 13, kind: output, shape index: {0}]   ;;  %s4360_s14 = inlined_call_operand.vmem [shape: f32[8,4], index: 14, kind: output, shape index: {1}]  }
   0x1   :  { %v2933_v0 = vld [vmem:[%s4349_s3 + $0x74] ss:$8 sps:$4 sm:$0xff]   ;;  %v2935_v1 = vld [vmem:[%s4349_s3 + $0x70] ss:$8 sps:$4 sm:$0xff]   ;;  %2930 = vset.pattern.permute.xlu0 %v3336_v2  ;;  %v2939_v5 = vld [vmem:[%s4349_s3 + $0x64] ss:$8 sps:$4 sm:$0xff]  }
   0x2   :  { %671 = vmatprep.subr.bf16.mxu0 %v2933_v0  ;;  %v2936_v3 = vld [vmem:[%s4349_s3 + $0x174] ss:$8 sps:$4 sm:$0xff]   ;;  %v2938_v4 = vld [vmem:[%s4349_s3 + $0x170] ss:$8 sps:$4 sm:$0xff]   ;;  %v2941_v6 = vld [vmem:[%s4349_s3 + $0x60] ss:$8 sps:$4 sm:$0xff]  }
   0x3   :  { %672 = vmatpush1.bf16.msra.mxu0 %v2935_v1  ;;  %712 = vmatprep.subr.bf16.mxu1 %v2936_v3  ;;  %v2942_v7 = vld [vmem:[%s4349_s3 + $0x164] ss:$8 sps:$4 sm:$0xff]   ;;  %v2944_v8 = vld [vmem:[%s4349_s3 + $0x160] ss:$8 sps:$4 sm:$0xff]   ;;  %v2945_v9 = vld [vmem:[%s4349_s3 + $0x54] ss:$8 sps:$4 sm:$0xff]  }
   0x4   :  { %713 = vmatpush1.bf16.msra.mxu1 %v2938_v4  ;;  %673 = vmatprep.subr.bf16.mxu0 %v2939_v5  ;;  %v2947_v10 = vld [vmem:[%s4349_s3 + $0x50] ss:$8 sps:$4 sm:$0xff]   ;;  %v2948_v11 = vld [vmem:[%s4349_s3 + $0x154] ss:$8 sps:$4 sm:$0xff]   ;;  %v2951_v12 = vld [vmem:[%s4349_s3 + $0x44] ss:$8 sps:$4 sm:$0xff]  }
   0x5   :  { %714 = vmatprep.subr.bf16.mxu1 %v2942_v7  ;;  %v2950_v13 = vld [vmem:[%s4349_s3 + $0x150] ss:$8 sps:$4 sm:$0xff]   ;;  %v2954_v14 = vld [vmem:[%s4349_s3 + $0x144] ss:$8 sps:$4 sm:$0xff]   ;;  %v2953_v15 = vld [vmem:[%s4349_s3 + $0x40] ss:$8 sps:$4 sm:$0xff]  }
   0x6   :  { %v2957_v16 = vld [vmem:[%s4349_s3 + $0x34] ss:$8 sps:$4 sm:$0xff]   ;;  %v2956_v17 = vld [vmem:[%s4349_s3 + $0x140] ss:$8 sps:$4 sm:$0xff]   ;;  %v2959_v19 = vld [vmem:[%s4349_s3 + $0x30] ss:$8 sps:$4 sm:$0xff]  }
   0x7   :  { %674 = vmatpush1.bf16.msra.mxu0 %v2941_v6  ;;  %v2960_v18 = vld [vmem:[%s4349_s3 + $0x134] ss:$8 sps:$4 sm:$0xff]   ;;  %v2963_v20 = vld [vmem:[%s4349_s3 + $0x24] ss:$8 sps:$4 sm:$0xff]   ;;  %v2962_v21 = vld [vmem:[%s4349_s3 + $0x130] ss:$8 sps:$4 sm:$0xff]  }
   0x8   :  { %675 = vmatprep.subr.bf16.mxu0 %v2945_v9  ;;  %715 = vmatpush1.bf16.msra.mxu1 %v2944_v8  ;;  %v2966_v22 = vld [vmem:[%s4349_s3 + $0x124] ss:$8 sps:$4 sm:$0xff]   ;;  %v2965_v23 = vld [vmem:[%s4349_s3 + $0x20] ss:$8 sps:$4 sm:$0xff]   ;;  %v2969_v24 = vld [vmem:[%s4349_s3 + $0x14] ss:$8 sps:$4 sm:$0xff]  }
   0x9   :  { %716 = vmatprep.subr.bf16.mxu1 %v2948_v11  ;;  %v2968_v25 = vld [vmem:[%s4349_s3 + $0x120] ss:$8 sps:$4 sm:$0xff]   ;;  %v2972_v26 = vld [vmem:[%s4349_s3 + $0x114] ss:$8 sps:$4 sm:$0xff]   ;;  %v2971_v27 = vld [vmem:[%s4349_s3 + $0x10] ss:$8 sps:$4 sm:$0xff]  }
   0xa   :  { %v2975_v28 = vld [vmem:[%s4349_s3 + $0x4] ss:$8 sps:$4 sm:$0xff]   ;;  %v2974_v29 = vld [vmem:[%s4349_s3 + $0x110] ss:$8 sps:$4 sm:$0xff]   ;;  %v2977_v31 = vld [vmem:[%s4349_s3] ss:$8 sps:$4 sm:$0xff]  }
   0xb   :  { %676 = vmatpush1.bf16.msra.mxu0 %v2947_v10  ;;  %v2978_v30 = vld [vmem:[%s4349_s3 + $0x104] ss:$8 sps:$4 sm:$0xff]   ;;  %v2981_v32 = vld [vmem:[%s4349_s3 + $0xf4] ss:$8 sps:$4 sm:$0xff]   ;;  %v2980_v33 = vld [vmem:[%s4349_s3 + $0x100] ss:$8 sps:$4 sm:$0xff]  }
   0xc   :  { %677 = vmatprep.subr.bf16.mxu0 %v2951_v12  ;;  %717 = vmatpush1.bf16.msra.mxu1 %v2950_v13  ;;  %v2984_v34 = vld [vmem:[%s4349_s3 + $0x1f4] ss:$8 sps:$4 sm:$0xff]   ;;  %v2983_v35 = vld [vmem:[%s4349_s3 + $0xf0] ss:$8 sps:$4 sm:$0xff]   ;;  %v2987_v36 = vld [vmem:[%s4349_s3 + $0xe4] ss:$8 sps:$4 sm:$0xff]  }
   0xd   :  { %718 = vmatprep.subr.bf16.mxu1 %v2954_v14  ;;  %v2986_v37 = vld [vmem:[%s4349_s3 + $0x1f0] ss:$8 sps:$4 sm:$0xff]   ;;  %v2990_v38 = vld [vmem:[%s4349_s3 + $0x1e4] ss:$8 sps:$4 sm:$0xff]   ;;  %v2989_v39 = vld [vmem:[%s4349_s3 + $0xe0] ss:$8 sps:$4 sm:$0xff]  }
   0xe   :  { %v2993_v40 = vld [vmem:[%s4349_s3 + $0xd4] ss:$8 sps:$4 sm:$0xff]   ;;  %v2992_v41 = vld [vmem:[%s4349_s3 + $0x1e0] ss:$8 sps:$4 sm:$0xff]   ;;  %v2995_v43 = vld [vmem:[%s4349_s3 + $0xd0] ss:$8 sps:$4 sm:$0xff]  }
   0xf   :  { %678 = vmatpush1.bf16.msra.mxu0 %v2953_v15  ;;  %v2996_v42 = vld [vmem:[%s4349_s3 + $0x1d4] ss:$8 sps:$4 sm:$0xff]   ;;  %v2999_v44 = vld [vmem:[%s4349_s3 + $0xc4] ss:$8 sps:$4 sm:$0xff]   ;;  %v2998_v45 = vld [vmem:[%s4349_s3 + $0x1d0] ss:$8 sps:$4 sm:$0xff]  }
  0x10   :  { %679 = vmatprep.subr.bf16.mxu0 %v2957_v16  ;;  %719 = vmatpush1.bf16.msra.mxu1 %v2956_v17  ;;  %v3002_v46 = vld [vmem:[%s4349_s3 + $0x1c4] ss:$8 sps:$4 sm:$0xff]   ;;  %v3001_v48 = vld [vmem:[%s4349_s3 + $0xc0] ss:$8 sps:$4 sm:$0xff]   ;;  %v3005_v50 = vld [vmem:[%s4349_s3 + $0xb4] ss:$8 sps:$4 sm:$0xff]  }
  0x11   :  { %720 = vmatprep.subr.bf16.mxu1 %v2960_v18  ;;  %v58_v47 = vld [vmem:[%s4346_s0 + $0x8] sm:$0xff]  ;;  %v60_v51 = vld [vmem:[%s4346_s0 + $0x18] sm:$0xff]  ;;  %v57_v6 = vld [vmem:[%s4346_s0] sm:$0xff] }
  0x12   :  { %v65_v49 = vpack.c.bf16 %v58_v47, %v58_v47  ;;  %v3004_v52 = vld [vmem:[%s4349_s3 + $0x1c0] ss:$8 sps:$4 sm:$0xff]   ;;  %v67_v53 = vpack.c.bf16 %v60_v51, %v60_v51  ;;  %v3008_v54 = vld [vmem:[%s4349_s3 + $0x1b4] ss:$8 sps:$4 sm:$0xff]   ;;  %v3007_v55 = vld [vmem:[%s4349_s3 + $0xb0] ss:$8 sps:$4 sm:$0xff]   ;;  %v64_v9 = vpack.c.bf16 %v57_v6, %v57_v6 }
  0x13   :  { %680 = vmatpush1.bf16.msra.mxu0 %v2959_v19  ;;  %v3011_v56 = vld [vmem:[%s4349_s3 + $0xa4] ss:$8 sps:$4 sm:$0xff]   ;;  %v3010_v57 = vld [vmem:[%s4349_s3 + $0x1b0] ss:$8 sps:$4 sm:$0xff]   ;;  %v3013_v59 = vld [vmem:[%s4349_s3 + $0xa0] ss:$8 sps:$4 sm:$0xff]  }
  0x14   :  { %681 = vmatprep.subr.bf16.mxu0 %v2963_v20  ;;  %721 = vmatpush1.bf16.msra.mxu1 %v2962_v21  ;;  %v3014_v58 = vld [vmem:[%s4349_s3 + $0x1a4] ss:$8 sps:$4 sm:$0xff]   ;;  %v3017_v60 = vld [vmem:[%s4349_s3 + $0x94] ss:$8 sps:$4 sm:$0xff]   ;;  %v3016_v61 = vld [vmem:[%s4349_s3 + $0x1a0] ss:$8 sps:$4 sm:$0xff]  }
  0x15   :  { %722 = vmatprep.subr.bf16.mxu1 %v2966_v22  ;;  %703 = vmatprep.mubr.bf16.mxu0 %v65_v49  ;;  %v3020_v62 = vld [vmem:[%s4349_s3 + $0x194] ss:$8 sps:$4 sm:$0xff]   ;;  %v3019_v63 = vld [vmem:[%s4349_s3 + $0x90] ss:$8 sps:$4 sm:$0xff]   ;;  %v3023_v0 = vld [vmem:[%s4349_s3 + $0x84] ss:$8 sps:$4 sm:$0xff]  }
  0x16   :  { %744 = vmatprep.mubr.bf16.mxu1 %v67_v53  ;;  %v3022_v1 = vld [vmem:[%s4349_s3 + $0x190] ss:$8 sps:$4 sm:$0xff]   ;;  %v3025_v3 = vld [vmem:[%s4349_s3 + $0x80] ss:$8 sps:$4 sm:$0xff]   ;;  %v3026_v4 = vld [vmem:[%s4349_s3 + $0x184] ss:$8 sps:$4 sm:$0xff]  }
  0x17   :  { %682 = vmatpush1.bf16.msra.mxu0 %v2965_v23  ;;  %v3028_v5 = vld [vmem:[%s4349_s3 + $0x180] ss:$8 sps:$4 sm:$0xff]   ;;  %v3031_v7 = vld [vmem:[%s4349_s3 + $0x274] ss:$8 sps:$4 sm:$0xff]   ;;  %v3029_v10 = vld [vmem:[%s4349_s3 + $0x270] ss:$8 sps:$4 sm:$0xff]  }
  0x18   :  { %683 = vmatprep.subr.bf16.mxu0 %v2969_v24  ;;  %723 = vmatpush1.bf16.msra.mxu1 %v2968_v25  ;;  %v59_v8 = vld [vmem:[%s4346_s0 + $0x10] sm:$0xff]  ;;  %v3034_v11 = vld [vmem:[%s4349_s3 + $0x264] ss:$8 sps:$4 sm:$0xff]   ;;  %v3074_v13 = vld [vmem:[%s4349_s3 + $0x300] ss:$8 sps:$4 sm:$0xff]  }
  0x19   :  { %724 = vmatprep.subr.bf16.mxu1 %v2972_v26  ;;  %v66_v12 = vpack.c.bf16 %v59_v8, %v59_v8  ;;  %v3076_v14 = vld [vmem:[%s4349_s3 + $0x304] ss:$8 sps:$4 sm:$0xff]   ;;  %v3032_v15 = vld [vmem:[%s4349_s3 + $0x260] ss:$8 sps:$4 sm:$0xff]   ;;  %v3037_v16 = vld [vmem:[%s4349_s3 + $0x254] ss:$8 sps:$4 sm:$0xff]  }
  0x1a   :  { %v63_v17 = vld [vmem:[%s4346_s0 + $0x30] sm:$0xff]  ;;  %v62_v18 = vld [vmem:[%s4346_s0 + $0x28] sm:$0xff]  ;;  %v3081_v51 = vld [vmem:[%s4350_s4 + $0x38] sm:$0xff]  }
  0x1b   :  { %684 = vmatpush1.bf16.msra.mxu0 %v2971_v27  ;;  %v69_v19 = vpack.c.bf16 %v62_v18, %v62_v18  ;;  %v3035_v20 = vld [vmem:[%s4349_s3 + $0x250] ss:$8 sps:$4 sm:$0xff]   ;;  %v3040_v21 = vld [vmem:[%s4349_s3 + $0x244] ss:$8 sps:$4 sm:$0xff]   ;;  %v70_v22 = vpack.c.bf16 %v63_v17, %v63_v17  ;;  %v3038_v23 = vld [vmem:[%s4349_s3 + $0x240] ss:$8 sps:$4 sm:$0xff]  }
  0x1c   :  { %685 = vmatprep.subr.bf16.mxu0 %v2975_v28  ;;  %725 = vmatpush1.bf16.msra.mxu1 %v2974_v29  ;;  %v3043_v24 = vld [vmem:[%s4349_s3 + $0x234] ss:$8 sps:$4 sm:$0xff]   ;;  %v3041_v25 = vld [vmem:[%s4349_s3 + $0x230] ss:$8 sps:$4 sm:$0xff]   ;;  %v3046_v26 = vld [vmem:[%s4349_s3 + $0x224] ss:$8 sps:$4 sm:$0xff]  }
  0x1d   :  { %726 = vmatprep.subr.bf16.mxu1 %v2978_v30  ;;  %v3044_v27 = vld [vmem:[%s4349_s3 + $0x220] ss:$8 sps:$4 sm:$0xff]   ;;  %v3049_v28 = vld [vmem:[%s4349_s3 + $0x214] ss:$8 sps:$4 sm:$0xff]   ;;  %v3047_v29 = vld [vmem:[%s4349_s3 + $0x210] ss:$8 sps:$4 sm:$0xff]  }
  0x1e   :  { %v3052_v30 = vld [vmem:[%s4349_s3 + $0x204] ss:$8 sps:$4 sm:$0xff]   ;;  %v3077_v47 = vld [vmem:[%s4349_s3 + $0x280] ss:$8 sps:$4 sm:$0xff]   ;;  %v3083_v53 = vld [vmem:[%s4350_s4 + $0x30] sm:$0xff]  }
  0x1f   :  { %686 = vmatpush1.bf16.msra.mxu0 %v2977_v31  ;;  %v3050_v31 = vld [vmem:[%s4349_s3 + $0x200] ss:$8 sps:$4 sm:$0xff]  }
  0x20   :  { %687 = vmatprep.subr.bf16.mxu0 %v2981_v32  ;;  %727 = vmatpush1.bf16.msra.mxu1 %v2980_v33  ;;  %v3055_v32 = vld [vmem:[%s4349_s3 + $0x2f4] ss:$8 sps:$4 sm:$0xff]   ;;  %v3053_v33 = vld [vmem:[%s4349_s3 + $0x2f0] ss:$8 sps:$4 sm:$0xff]  }
  0x21   :  { %728 = vmatprep.subr.bf16.mxu1 %v2984_v34  ;;  %v3058_v34 = vld [vmem:[%s4349_s3 + $0x2e4] ss:$8 sps:$4 sm:$0xff]  }
  0x23   :  { %688 = vmatpush2.bf16.msra.mxu0 %v2983_v35  ;;  %v3056_v35 = vld [vmem:[%s4349_s3 + $0x2e0] ss:$8 sps:$4 sm:$0xff]  }
  0x24   :  { %689 = vmatprep.subr.bf16.mxu0 %v2987_v36  ;;  %729 = vmatpush2.bf16.msra.mxu1 %v2986_v37  ;;  %v3061_v36 = vld [vmem:[%s4349_s3 + $0x2d4] ss:$8 sps:$4 sm:$0xff]   ;;  %v3059_v37 = vld [vmem:[%s4349_s3 + $0x2d0] ss:$8 sps:$4 sm:$0xff]  }
  0x25   :  { %730 = vmatprep.subr.bf16.mxu1 %v2990_v38  ;;  %v3064_v38 = vld [vmem:[%s4349_s3 + $0x2c4] ss:$8 sps:$4 sm:$0xff]  }
  0x27   :  { %690 = vmatpush2.bf16.msra.mxu0 %v2989_v39  ;;  %v3062_v39 = vld [vmem:[%s4349_s3 + $0x2c0] ss:$8 sps:$4 sm:$0xff]  }
  0x28   :  { %691 = vmatprep.subr.bf16.mxu0 %v2993_v40  ;;  %731 = vmatpush2.bf16.msra.mxu1 %v2992_v41  ;;  %v3067_v40 = vld [vmem:[%s4349_s3 + $0x2b4] ss:$8 sps:$4 sm:$0xff]   ;;  %v3065_v41 = vld [vmem:[%s4349_s3 + $0x2b0] ss:$8 sps:$4 sm:$0xff]  }
  0x29   :  { %732 = vmatprep.subr.bf16.mxu1 %v2996_v42  ;;  %v3070_v42 = vld [vmem:[%s4349_s3 + $0x2a4] ss:$8 sps:$4 sm:$0xff]  }
  0x2b   :  { %692 = vmatpush2.bf16.msra.mxu0 %v2995_v43  ;;  %v3068_v43 = vld [vmem:[%s4349_s3 + $0x2a0] ss:$8 sps:$4 sm:$0xff]  }
  0x2c   :  { %693 = vmatprep.subr.bf16.mxu0 %v2999_v44  ;;  %733 = vmatpush2.bf16.msra.mxu1 %v2998_v45  ;;  %v3073_v44 = vld [vmem:[%s4349_s3 + $0x294] ss:$8 sps:$4 sm:$0xff]   ;;  %v3071_v45 = vld [vmem:[%s4349_s3 + $0x290] ss:$8 sps:$4 sm:$0xff]  }
  0x2d   :  { %734 = vmatprep.subr.bf16.mxu1 %v3002_v46  ;;  %v3079_v46 = vld [vmem:[%s4349_s3 + $0x284] ss:$8 sps:$4 sm:$0xff]  }
  0x2f   :  { %694 = vmatpush2.bf16.msra.mxu0 %v3001_v48  ;;  %v61_v48 = vld [vmem:[%s4346_s0 + $0x20] sm:$0xff] }
  0x30   :  { %695 = vmatprep.subr.bf16.mxu0 %v3005_v50  ;;  %735 = vmatpush2.bf16.msra.mxu1 %v3004_v52  ;;  %v68_v49 = vpack.c.bf16 %v61_v48, %v61_v48  ;;  %v3080_v50 = vld [vmem:[%s4350_s4 + $0x78] sm:$0xff]   ;;  %v3082_v52 = vld [vmem:[%s4350_s4 + $0x70] sm:$0xff]  }
  0x31   :  { %736 = vmatprep.subr.bf16.mxu1 %v3008_v54  ;;  %v3084_v54 = vld [vmem:[%s4350_s4 + $0x68] sm:$0xff]  }
  0x33   :  { %696 = vmatpush2.bf16.msra.mxu0 %v3007_v55 }
  0x34   :  { %697 = vmatprep.subr.bf16.mxu0 %v3011_v56  ;;  %737 = vmatpush2.bf16.msra.mxu1 %v3010_v57 }
  0x35   :  { %738 = vmatprep.subr.bf16.mxu1 %v3014_v58 }
  0x37   :  { %698 = vmatpush2.bf16.msra.mxu0 %v3013_v59 }
  0x38   :  { %699 = vmatprep.subr.bf16.mxu0 %v3017_v60  ;;  %739 = vmatpush2.bf16.msra.mxu1 %v3016_v61 }
  0x39   :  { %740 = vmatprep.subr.bf16.mxu1 %v3020_v62 }
  0x3b   :  { %700 = vmatpush2.bf16.msra.mxu0 %v3019_v63 }
  0x3c   :  { %701 = vmatprep.subr.bf16.mxu0 %v3023_v0  ;;  %741 = vmatpush2.bf16.msra.mxu1 %v3022_v1 }
  0x3d   :  { %742 = vmatprep.subr.bf16.mxu1 %v3026_v4 }
  0x3f   :  { %702 = vmatpush2.bf16.msra.mxu0 %v3025_v3 }
  0x40   :  { %753 = vmatprep.subr.bf16.mxu0 %v3031_v7  ;;  %743 = vmatpush2.bf16.msra.mxu1 %v3028_v5 }
  0x41   :  { %808 = vmatprep.subr.bf16.mxu1 %v3076_v14 }
  0x42   :  { %704 = vmatmul.mubr.bf16.vlgmr.msra.gmra.mxu0 %v64_v9 }
  0x43   :  { %754 = vmatpush1.bf16.msra.mxu0 %v3029_v10  ;;  %745 = vmatmul.mubr.bf16.vlgmr.msra.gmra.mxu1 %v66_v12 }
  0x44   :  { %755 = vmatprep.subr.bf16.mxu0 %v3034_v11  ;;  %809 = vmatpush1.bf16.msra.mxu1 %v3074_v13 }
  0x45   :  { %826 = vmatprep.mubr.bf16.mxu1 %v3336_v2  ;;  %785 = vmatprep.mubr.bf16.mxu0 %v69_v19 }
  0x46   :  { %2801 = vmatprep.subr.bf16.mxu1 %v3080_v50 }
  0x47   :  { %756 = vmatpush1.bf16.msra.mxu0 %v3032_v15 }
  0x48   :  { %757 = vmatprep.subr.bf16.mxu0 %v3037_v16 }
  0x4b   :  { %758 = vmatpush1.bf16.msra.mxu0 %v3035_v20  ;;  %2634 = vmatmul.mubr.msk.bf16.vlgmr.msra.gmra.mxu1 %vm667_vm0, %v70_v22 }
  0x4c   :  { %759 = vmatprep.subr.bf16.mxu0 %v3040_v21  ;;  %2802 = vmatpush3.bf16.msra.mxu1 %v3081_v51 }
  0x4d   :  { %2803 = vmatprep.subr.bf16.mxu1 %v3082_v52 }
  0x4f   :  { %760 = vmatpush1.bf16.msra.mxu0 %v3038_v23 }
  0x50   :  { %761 = vmatprep.subr.bf16.mxu0 %v3043_v24 }
  0x53   :  { %762 = vmatpush1.bf16.msra.mxu0 %v3041_v25 }
  0x54   :  { %763 = vmatprep.subr.bf16.mxu0 %v3046_v26 }
  0x57   :  { %764 = vmatpush1.bf16.msra.mxu0 %v3044_v27 }
  0x58   :  { %765 = vmatprep.subr.bf16.mxu0 %v3049_v28 }
  0x5b   :  { %766 = vmatpush1.bf16.msra.mxu0 %v3047_v29 }
  0x5c   :  { %767 = vmatprep.subr.bf16.mxu0 %v3052_v30 }
  0x5f   :  { %768 = vmatpush1.bf16.msra.mxu0 %v3050_v31 }
  0x60   :  { %769 = vmatprep.subr.bf16.mxu0 %v3055_v32 }
  0x63   :  { %770 = vmatpush2.bf16.msra.mxu0 %v3053_v33 }
  0x64   :  { %771 = vmatprep.subr.bf16.mxu0 %v3058_v34 }
  0x67   :  { %772 = vmatpush2.bf16.msra.mxu0 %v3056_v35 }
  0x68   :  { %773 = vmatprep.subr.bf16.mxu0 %v3061_v36 }
  0x6b   :  { %774 = vmatpush2.bf16.msra.mxu0 %v3059_v37 }
  0x6c   :  { %775 = vmatprep.subr.bf16.mxu0 %v3064_v38 }
  0x6f   :  { %776 = vmatpush2.bf16.msra.mxu0 %v3062_v39 }
  0x70   :  { %777 = vmatprep.subr.bf16.mxu0 %v3067_v40 }
  0x73   :  { %778 = vmatpush2.bf16.msra.mxu0 %v3065_v41 }
  0x74   :  { %779 = vmatprep.subr.bf16.mxu0 %v3070_v42 }
  0x77   :  { %780 = vmatpush2.bf16.msra.mxu0 %v3068_v43 }
  0x78   :  { %781 = vmatprep.subr.bf16.mxu0 %v3073_v44 }
  0x7b   :  { %782 = vmatpush2.bf16.msra.mxu0 %v3071_v45 }
  0x7c   :  { %783 = vmatprep.subr.bf16.mxu0 %v3079_v46 }
  0x7f   :  { %784 = vmatpush2.bf16.msra.mxu0 %v3077_v47 }
  0x82   :  { %786 = vmatmul.mubr.bf16.vlgmr.msra.gmra.mxu0 %v68_v49 }
  0x83   :  { %20 = vsyncpa [#allocation3], 0  ;;  %2804 = vmatpush3.bf16.msra.mxu1 %v3083_v53  ;;  %v3085_v55 = vld [vmem:[%s4350_s4 + $0x28] sm:$0xff]   ;;  %v3086_v56 = vld [vmem:[%s4350_s4 + $0x60] sm:$0xff]   ;;  %v3337_v3 = vmov 0.0   ;;  %v169_v16 = vlaneseq  ;;  %vm3338_vm1 = vmmov 0  }
  0x84   :  { %2805 = vmatprep.subr.bf16.mxu1 %v3084_v54  ;;  %v3087_v57 = vld [vmem:[%s4350_s4 + $0x20] sm:$0xff]   ;;  %v3088_v58 = vld [vmem:[%s4350_s4 + $0x58] sm:$0xff]   ;;  %v3090_v60 = vld [vmem:[%s4350_s4 + $0x50] sm:$0xff]   ;;  %2888 = vmatprep.subr.bf16.mxu0 %v3337_v3  ;;  %vm1159_vm2 = vcmask 523264   ;;  %vm2516_vm3 = vcmask 31744   ;;  %s3340_s20 = smov 126  }
  0x85   :  { %v3089_v59 = vld [vmem:[%s4350_s4 + $0x18] sm:$0xff]   ;;  %v3091_v61 = vld [vmem:[%s4350_s4 + $0x10] sm:$0xff]   ;;  %v3092_v62 = vld [vmem:[%s4350_s4 + $0x48] sm:$0xff]   ;;  %v3785_v17 = vshrl.u32 %v169_v16, 7  ;;  %2896 = vmatprep.mubr.msk.bf16.mxu0 %vm3338_vm1, %v3337_v3  ;;  %s3341_s22 = smov [#allocation2]  }
  0x86   :  { %v3093_v63 = vld [vmem:[%s4350_s4 + $0x8] sm:$0xff]   ;;  %v3094_v0 = vld [vmem:[%s4350_s4 + $0x40] sm:$0xff]   ;;  %v3096_v38 = vld [vmem:[%s4351_s5 + $0x38] sm:$0xff]   ;;  %s2524_s23 = sshll.u32 %s3341_s22, 4  ;;  %s2525_s23 = int_to_ptr.vmem [resolvable:$true] %s2524_s23 }
  0x87   :  { %2806 = vmatpush3.bf16.msra.mxu1 %v3085_v55  ;;  %v3095_v1 = vld [vmem:[%s4350_s4] sm:$0xff]   ;;  %v3788_v18 = vsub.s32 0, %v3785_v17  ;;  %v49_v20 = vld [vmem:[%s4348_s2 + $0x8] sm:$0xff]  ;;  %v3097_v40 = vld [vmem:[%s4351_s5 + $0x30] sm:$0xff]   ;;  %v3846_v49 = vsub.s32 1, %v3785_v17  ;;  %p3319_p1 = scmp.lt.s32.totalorder %s2525_s23, %s2525_s23 }
  0x88   :  { %2807 = vmatprep.subr.bf16.mxu1 %v3086_v56  ;;  %v3793_v19 = vld [vmem:[%s4348_s2] sm:$0xff]  ;;  %v3098_v41 = vld [vmem:[%s4351_s5 + $0x28] sm:$0xff]   ;;  %v3100_v43 = vld [vmem:[%s4351_s5 + $0x18] sm:$0xff]  }
  0x89   :  { %v172_v21 = vrot.slane %v3793_v19, %v3788_v18  ;;  %v176_v22 = vrot.slane %v49_v20, %v3788_v18  ;;  %v3099_v42 = vld [vmem:[%s4351_s5 + $0x20] sm:$0xff]   ;;  %v3101_v44 = vld [vmem:[%s4351_s5 + $0x10] sm:$0xff]   ;;  %v3102_v45 = vld [vmem:[%s4351_s5 + $0x8] sm:$0xff]   ;;  %v874_v51 = vrot.slane %v3793_v19, %v3846_v49 }
  0x8a   :  { %v3103_v46 = vld [vmem:[%s4351_s5] sm:$0xff]   ;;  %v3104_v47 = vld [vmem:[%s4352_s6 + $0x18] sm:$0xff]   ;;  %v3105_v48 = vld [vmem:[%s4352_s6 + $0x10] sm:$0xff]  }
  0x8b   :  { %2808 = vmatpush3.bf16.msra.mxu1 %v3087_v57  ;;  %2889 = vmatpush3.bf16.msra.mxu0 %v3104_v47 }
  0x8c   :  { %2809 = vmatprep.subr.bf16.mxu1 %v3088_v58  ;;  %2890 = vmatprep.subr.bf16.mxu0 %v3337_v3 }
  0x8f   :  { %2810 = vmatpush3.bf16.msra.mxu1 %v3089_v59  ;;  %2891 = vmatpush3.bf16.msra.mxu0 %v3105_v48  ;;  %v3106_v59 = vld [vmem:[%s4352_s6 + $0x8] sm:$0xff]  }
  0x90   :  { %2811 = vmatprep.subr.bf16.mxu1 %v3090_v60  ;;  %2892 = vmatprep.subr.bf16.mxu0 %v3337_v3  ;;  %v3107_v60 = vld [vmem:[%s4352_s6] sm:$0xff]  }
  0x93   :  { %2812 = vmatpush3.bf16.msra.mxu1 %v3091_v61  ;;  %2893 = vmatpush3.bf16.msra.mxu0 %v3106_v59  ;;  %v3108_v61 = vld [vmem:[%s4353_s7] sm:$0xff]   ;;  %v3120_v59 = vld [vmem:[%s4357_s11 + $0x50] ss:$8 sps:$4 sm:$0xff]  }
  0x94   :  { %2813 = vmatprep.subr.bf16.mxu1 %v3092_v62  ;;  %2894 = vmatprep.subr.bf16.mxu0 %v3337_v3  ;;  %v1031_v62 = vsub.s32 2, %v3785_v17 }
  0x97   :  { %2814 = vmatpush3.bf16.msra.mxu1 %v3093_v63  ;;  %2895 = vmatpush3.bf16.msra.mxu0 %v3107_v60  ;;  %v1032_v63 = vrot.slane %v3793_v19, %v1031_v62  ;;  %v3125_v60 = vld [vmem:[%s4357_s11 + $0x44] ss:$8 sps:$4 sm:$0xff]   ;;  %v3128_v62 = vld [vmem:[%s4357_s11 + $0x34] ss:$8 sps:$4 sm:$0xff]  }
  0x98   :  { %2815 = vmatprep.subr.bf16.mxu1 %v3094_v0  ;;  %2906 = vmatprep.subr.bf16.mxu0 %v3337_v3 }
  0x9b   :  { %2816 = vmatpush3.bf16.msra.mxu1 %v3095_v1 }
  0x9c   :  { %2868 = vmatprep.subr.bf16.mxu1 %v3337_v3 }
 0x102   :  { %v705_v4 = vpop.f32.mrf.mxu0 }
 0x103   :  { %v746_v6 = vpop.f32.mrf.mxu1  ;;  %v706_v23 = vadd.f32 %v705_v4, %v172_v21  ;;  %v1209_v21 = vsub.s32 4, %v3785_v17 }
 0x104   :  { %v707_v5 = vpop.f32.mrf.mxu0 }
 0x105   :  { %v748_v8 = vpop.f32.mrf.mxu1  ;;  %v708_v24 = vadd.f32 %v707_v5, %v176_v22  ;;  %v747_v25 = vadd.f32 %v746_v6, %v706_v23  ;;  %v1210_v22 = vrot.slane %v3793_v19, %v1209_v21  ;;  %v3140_v21 = vld [vmem:[%s4358_s12 + $0x18c] ss:$28 sps:$4 sm:$0xff]  }
 0x106   :  { %v709_v7 = vpop.f32.mrf.mxu0 }
 0x107   :  { %v750_v10 = vpop.f32.mrf.mxu1  ;;  %v749_v27 = vadd.f32 %v748_v8, %v708_v24 }
 0x108   :  { %v710_v9 = vpop.f32.mrf.mxu0 }
 0x109   :  { %v751_v11 = vpop.f32.mrf.mxu1  ;;  %v1133_v9 = vsub.s32 3, %v3785_v17 }
 0x10b   :  { %v828_v12 = vpop.f32.mrf.mxu1  ;;  %v1134_v10 = vrot.slane %v3793_v19, %v1133_v9 }
 0x10d   :  { %v830_v13 = vpop.f32.mrf.mxu1 }
 0x10f   :  { %v832_v14 = vpop.f32.mrf.mxu1 }
 0x111   :  { %v833_v15 = vpop.f32.mrf.mxu1 }
 0x142   :  { %v787_v26 = vpop.f32.mrf.mxu0 }
 0x143   :  { %v788_v28 = vadd.f32 %v787_v26, %v747_v25 }
 0x144   :  { %v789_v29 = vpop.f32.mrf.mxu0 }
 0x145   :  { %v829_v30 = vadd.f32 %v828_v12, %v788_v28  ;;  %v790_v31 = vadd.f32 %v789_v29, %v749_v27 }
 0x146   :  { %v791_v32 = vpop.f32.mrf.mxu0 }
 0x147   :  { %v831_v33 = vadd.f32 %v830_v13, %v790_v31  ;;  %v835_v34 = vmax.f32 %v829_v30, 0.0  ;;  %v3339_v30 = vmov 1   ;;  %v1263_v32 = vld [vmem:[%s4347_s1] sm:$0xff] }
 0x148   :  { %v792_v35 = vpop.f32.mrf.mxu0  ;;  %2931 = vset.pattern.permute.xlu1 %v3339_v30 }
 0x149   :  { %v836_v36 = vmax.f32 %v831_v33, 0.0  ;;  %v837_v39 = vpack.c.bf16 %v835_v34, %v835_v34 }
 0x14b   :  { %v838_v37 = vpack.c.bf16 %v836_v36, %v836_v36  ;;  %v3109_v36 = vld [vmem:[%s4355_s9] sm:$0xff]  }
 0x14d   :  { %1003 = vmatprep.mubr.bf16.mxu1 %v838_v37  ;;  %v3110_v37 = vld [vmem:[%s4356_s10 + $0x18] sm:$0xff]  }
 0x14e   :  { %1004 = vmatmul.mubr.bf16.vlgmr.msra.gmra.mxu1 %v837_v39  ;;  %v1270_v39 = vld [vmem:[%s4354_s8] sm:$0x1] }
 0x14f   :  { %2869 = vmatpush3.bf16.msra.mxu1 %v3096_v38  ;;  %2884 = vmatprep.mubr.msk.bf16.mxu1 %vm3338_vm1, %v3337_v3  ;;  %v3111_v38 = vld [vmem:[%s4356_s10 + $0x10] sm:$0xff]  }
 0x150   :  { %2870 = vmatprep.subr.bf16.mxu1 %v3337_v3 }
 0x153   :  { %2871 = vmatpush3.bf16.msra.mxu1 %v3097_v40  ;;  %v1271_v40 = vunpack.c.l.bf16 %v1270_v39  ;;  %v3194_v39 = vld [vmem:[%s4358_s12 + $0x314] ss:$28 sps:$4 sm:$0xff]  }
 0x154   :  { %2872 = vmatprep.subr.bf16.mxu1 %v3337_v3 }
 0x157   :  { %2873 = vmatpush3.bf16.msra.mxu1 %v3098_v41  ;;  %v1289_v41 = vrot.slane %v1271_v40, %v3846_v49 }
 0x158   :  { %2874 = vmatprep.subr.bf16.mxu1 %v3337_v3 }
 0x15b   :  { %2875 = vmatpush3.bf16.msra.mxu1 %v3099_v42  ;;  %v1280_v42 = vrot.slane %v1271_v40, %v3788_v18  ;;  %v3192_v40 = vld [vmem:[%s4358_s12 + $0x310] ss:$28 sps:$4 sm:$0xff]  }
 0x15c   :  { %2876 = vmatprep.subr.bf16.mxu1 %v3337_v3 }
 0x15f   :  { %2877 = vmatpush3.bf16.msra.mxu1 %v3100_v43  ;;  %v1294_v43 = vsub.s32 5, %v3785_v17 }
 0x160   :  { %2878 = vmatprep.subr.bf16.mxu1 %v3337_v3 }
 0x161   :  { %v1295_v47 = vrot.slane %v3793_v19, %v1294_v43  ;;  %v3206_v43 = vld [vmem:[%s4358_s12 + $0x2a4] ss:$28 sps:$4 sm:$0xff]  }
 0x163   :  { %2879 = vmatpush3.bf16.msra.mxu1 %v3101_v44 }
 0x164   :  { %2880 = vmatprep.subr.bf16.mxu1 %v3337_v3 }
 0x167   :  { %2881 = vmatpush3.bf16.msra.mxu1 %v3102_v45 }
 0x168   :  { %2882 = vmatprep.subr.bf16.mxu1 %v3337_v3 }
 0x16b   :  { %2883 = vmatpush3.bf16.msra.mxu1 %v3103_v46 }
 0x16c   :  { %2900 = vmatprep.subr.bf16.mxu1 %v3337_v3 }
 0x20e   :  { %v2817_v50 = vpop.f32.mrf.mxu1 }
 0x210   :  { %v2818_v52 = vpop.f32.mrf.mxu1 }
 0x211   :  { %v2819_v53 = vadd.f32 %v2818_v52, %v2817_v50 }
 0x212   :  { %v2820_v54 = vpop.f32.mrf.mxu1 }
 0x213   :  { %v1006_v55 = vadd.f32 %v2819_v53, %v874_v51  ;;  %v3112_v54 = vld [vmem:[%s4356_s10 + $0x8] sm:$0xff]  }
 0x214   :  { %v2821_v56 = vpop.f32.mrf.mxu1 }
 0x215   :  { %v1011_v57 = vmax.f32 %v1006_v55, 0.0  ;;  %v3113_v55 = vld [vmem:[%s4356_s10] sm:$0xff]   ;;  %v3114_v56 = vld [vmem:[%s4357_s11 + $0x70] ss:$8 sps:$4 sm:$0xff]  }
 0x217   :  { %v1012_v58 = vpack.c.bf16 %v1011_v57, %v1011_v57  ;;  %v3119_v57 = vld [vmem:[%s4357_s11 + $0x64] ss:$8 sps:$4 sm:$0xff]  }
 0x219   :  { %2885 = vmatmul.mubr.bf16.vlgmr.msra.gmra.mxu1 %v1012_v58  ;;  %v3122_v58 = vld [vmem:[%s4357_s11 + $0x54] ss:$8 sps:$4 sm:$0xff]  }
 0x21a   :  { %2902 = vmatprep.mubr.msk.bf16.mxu1 %vm3338_vm1, %v3337_v3  ;;  %2901 = vmatpush3.bf16.msra.mxu1 %v3108_v61  ;;  %v3123_v61 = vld [vmem:[%s4357_s11 + $0x40] ss:$8 sps:$4 sm:$0xff]  }
 0x21b   :  { %2912 = vmatprep.subr.bf16.mxu1 %v3337_v3 }
 0x2d9   :  { %v1115_v0 = vpop.f32.mrf.mxu1 }
 0x2da   :  { %v1116_v1 = vadd.f32 %v1115_v0, %v1032_v63  ;;  %v3126_v63 = vld [vmem:[%s4357_s11 + $0x30] ss:$8 sps:$4 sm:$0xff]   ;;  %v3131_v0 = vld [vmem:[%s4357_s11 + $0x24] ss:$8 sps:$4 sm:$0xff]  }
 0x2db   :  { %v2886_v4 = vpop.f32.mrf.mxu1 }
 0x2dc   :  { %v1121_v5 = vmax.f32 %v1116_v1, 0.0  ;;  %v3129_v1 = vld [vmem:[%s4357_s11 + $0x20] ss:$8 sps:$4 sm:$0xff]   ;;  %v3134_v4 = vld [vmem:[%s4357_s11 + $0x14] ss:$8 sps:$4 sm:$0xff]  }
 0x2dd   :  { %v1118_v6 = vpop.f32.mrf.mxu1 }
 0x2de   :  { %v1122_v7 = vpack.c.bf16 %v1121_v5, %v1121_v5  ;;  %v3132_v5 = vld [vmem:[%s4357_s11 + $0x10] ss:$8 sps:$4 sm:$0xff]   ;;  %v1303_v6 = vsub.s32 6, %v3785_v17 }
 0x2df   :  { %v2887_v8 = vpop.f32.mrf.mxu1 }
 0x2e0   :  { %2897 = vmatmul.mubr.msk.bf16.vlgmr.msra.gmra.mxu0 %vm1159_vm2, %v1122_v7  ;;  %v1304_v7 = vrot.slane %v3793_v19, %v1303_v6  ;;  %v3185_v6 = vld [vmem:[%s4358_s12 + $0xc] ss:$28 sps:$4 sm:$0xff]  }
 0x2e1   :  { %2908 = vmatprep.mubr.msk.bf16.mxu0 %vm3338_vm1, %v3337_v3  ;;  %2907 = vmatpush3.bf16.msra.mxu0 %v3109_v36  ;;  %v3180_v36 = vld [vmem:[%s4358_s12] ss:$28 sps:$4 sm:$0xff]  }
 0x3a0   :  { %v1197_v11 = vpop.f32.mrf.mxu0 }
 0x3a1   :  { %v1198_v12 = vadd.f32 %v1197_v11, %v1134_v10 }
 0x3a2   :  { %v2898_v13 = vpop.f32.mrf.mxu0 }
 0x3a3   :  { %v1203_v14 = vmax.f32 %v1198_v12, 0.0 }
 0x3a4   :  { %v1200_v15 = vpop.f32.mrf.mxu0 }
 0x3a5   :  { %v1204_v16 = vpack.c.bf16 %v1203_v14, %v1203_v14  ;;  %v3137_v15 = vld [vmem:[%s4357_s11 + $0x4] ss:$8 sps:$4 sm:$0xff]  }
 0x3a6   :  { %v2899_v20 = vpop.f32.mrf.mxu0 }
 0x3a7   :  { %2903 = vmatmul.mubr.msk.bf16.vlgmr.msra.gmra.mxu1 %vm667_vm0, %v1204_v16  ;;  %v3135_v16 = vld [vmem:[%s4357_s11] ss:$8 sps:$4 sm:$0xff]  }
 0x3a8   :  { %2920 = vmatprep.mubr.msk.bf16.mxu1 %vm3338_vm1, %v3337_v3  ;;  %2913 = vmatpush3.bf16.msra.mxu1 %v3110_v37  ;;  %v3138_v20 = vld [vmem:[%s4358_s12 + $0x188] ss:$28 sps:$4 sm:$0xff]  }
 0x3a9   :  { %2914 = vmatprep.subr.bf16.mxu1 %v3337_v3  ;;  %v3188_v37 = vld [vmem:[%s4358_s12 + $0x34c] ss:$28 sps:$4 sm:$0xff]  }
 0x3ac   :  { %2915 = vmatpush3.bf16.msra.mxu1 %v3111_v38  ;;  %v3186_v38 = vld [vmem:[%s4358_s12 + $0x348] ss:$28 sps:$4 sm:$0xff]  }
 0x3ad   :  { %2916 = vmatprep.subr.bf16.mxu1 %v3337_v3 }
 0x3b0   :  { %2917 = vmatpush3.bf16.msra.mxu1 %v3112_v54 }
 0x3b1   :  { %2918 = vmatprep.subr.bf16.mxu1 %v3337_v3  ;;  %v3117_v3 = vld [vmem:[%s4357_s11 + $0x60] ss:$8 sps:$4 sm:$0xff]  }
 0x3b4   :  { %2919 = vmatpush3.bf16.msra.mxu1 %v3113_v55 }
 0x3b5   :  { %2318 = vmatprep.subr.bf16.mxu1 %v3140_v21  ;;  %v3221_v21 = vld [vmem:[%s4358_s12 + $0x23c] ss:$28 sps:$4 sm:$0xff]  }
 0x467   :  { %v1254_v23 = vpop.f32.mrf.mxu1 }
 0x468   :  { %v1255_v24 = vadd.f32 %v1254_v23, %v1210_v22  ;;  %v3143_v22 = vld [vmem:[%s4358_s12 + $0x194] ss:$28 sps:$4 sm:$0xff]  }
 0x469   :  { %v2904_v25 = vpop.f32.mrf.mxu1  ;;  %v3146_v23 = vld [vmem:[%s4358_s12 + $0x154] ss:$28 sps:$4 sm:$0xff]  }
 0x46a   :  { %v1260_v26 = vmul.f32 0.5, %v1255_v24  ;;  %2517 = vst.msk [vmem:[%s4360_s14] sm:$0xff] %vm2516_vm3, %v1255_v24  ;;  %v3152_v25 = vld [vmem:[%s4358_s12 + $0x11c] ss:$28 sps:$4 sm:$0xff]  }
 0x46b   :  { %v1257_v27 = vpop.f32.mrf.mxu1 }
 0x46c   :  { %v1261_v28 = vmul.f32 1.442695, %v1260_v26  ;;  %v3150_v26 = vld [vmem:[%s4358_s12 + $0x118] ss:$28 sps:$4 sm:$0xff]   ;;  %v3158_v27 = vld [vmem:[%s4358_s12 + $0xe4] ss:$28 sps:$4 sm:$0xff]  }
 0x46d   :  { %v2905_v29 = vpop.f32.mrf.mxu1 }
 0x46e   :  { %3298 = vpow2.f32 %v1261_v28  ;;  %v3156_v28 = vld [vmem:[%s4358_s12 + $0xe0] ss:$28 sps:$4 sm:$0xff]   ;;  %v3164_v29 = vld [vmem:[%s4358_s12 + $0xac] ss:$28 sps:$4 sm:$0xff]  }
 0x47b   :  { %v3299_v31 = vpop.eup %3298 }
 0x47c   :  { %1265 = vrot.lane.b32.xlu0 %v3299_v31, %s3340_s20  ;;  %v3170_v31 = vld [vmem:[%s4358_s12 + $0x74] ss:$28 sps:$4 sm:$0xff]  }
 0x4ee   :  { %v1266_v33 = vpop.permute.xlu0 %1265 }
 0x4ef   :  { %v1268_v34 = vmul.f32 %v1266_v33, %v1263_v32  ;;  %v3168_v32 = vld [vmem:[%s4358_s12 + $0x70] ss:$28 sps:$4 sm:$0xff]   ;;  %v3176_v33 = vld [vmem:[%s4358_s12 + $0x3c] ss:$28 sps:$4 sm:$0xff]  }
 0x4f1   :  { %v1269_v35 = vadd.f32 %v1268_v34, %v1255_v24  ;;  %v3144_v24 = vld [vmem:[%s4358_s12 + $0x150] ss:$28 sps:$4 sm:$0xff]   ;;  %v3174_v34 = vld [vmem:[%s4358_s12 + $0x38] ss:$28 sps:$4 sm:$0xff]  }
 0x4f3   :  { %1283 = vperm.xlu1 %2931, %v1269_v35   ;;  %1274 = vperm.xlu0 %2930, %v1269_v35   ;;  %v3182_v35 = vld [vmem:[%s4358_s12 + $0x4] ss:$28 sps:$4 sm:$0xff]  }
 0x4f7   :  { %2932 = vset.pattern.permute.xlu0 %v3339_v30  ;;  %v3162_v30 = vld [vmem:[%s4358_s12 + $0xa8] ss:$28 sps:$4 sm:$0xff]  }
 0x56e   :  { %v1284_v44 = vpop.permute.xlu1 %1283  ;;  %v1275_v45 = vpop.permute.xlu0 %1274 }
 0x56f   :  { %v1290_v46 = vmul.f32 %v1289_v41, %v1284_v44  ;;  %v1281_v48 = vmul.f32 %v1280_v42, %v1275_v45  ;;  %v3200_v41 = vld [vmem:[%s4358_s12 + $0x2dc] ss:$28 sps:$4 sm:$0xff]   ;;  %v3212_v45 = vld [vmem:[%s4358_s12 + $0x26c] ss:$28 sps:$4 sm:$0xff]  }
 0x570   :  { %v3198_v42 = vld [vmem:[%s4358_s12 + $0x2d8] ss:$28 sps:$4 sm:$0xff]   ;;  %v3204_v44 = vld [vmem:[%s4358_s12 + $0x2a0] ss:$28 sps:$4 sm:$0xff]  }
 0x571   :  { %v1291_v50 = vadd.f32 %v1290_v46, %v1281_v48  ;;  %v3210_v46 = vld [vmem:[%s4358_s12 + $0x268] ss:$28 sps:$4 sm:$0xff]   ;;  %v3216_v48 = vld [vmem:[%s4358_s12 + $0x230] ss:$28 sps:$4 sm:$0xff]  }
 0x573   :  { %v1296_v51 = vadd.f32 %v1295_v47, %v1291_v50  ;;  %v3218_v47 = vld [vmem:[%s4358_s12 + $0x234] ss:$28 sps:$4 sm:$0xff]   ;;  %v1366_v50 = vsub.s32 7, %v3785_v17 }
 0x574   :  { %v3147_v17 = vld [vmem:[%s4358_s12 + $0x158] ss:$28 sps:$4 sm:$0xff]  }
 0x575   :  { %v1297_v52 = vmax.f32 %v1296_v51, 0.0  ;;  %v1367_v51 = vrot.slane %v3793_v19, %v1366_v50  ;;  %v3155_v19 = vld [vmem:[%s4358_s12 + $0x124] ss:$28 sps:$4 sm:$0xff]  }
 0x576   :  { %v3242_v50 = vld [vmem:[%s4358_s12 + $0x328] ss:$28 sps:$4 sm:$0xff]  }
 0x577   :  { %v1298_v53 = vpack.c.bf16 %v1297_v52, %v1297_v52 }
 0x579   :  { %2909 = vmatmul.mubr.msk.bf16.vlgmr.msra.gmra.mxu0 %vm667_vm0, %v1298_v53 }
 0x57a   :  { %1573 = vmatprep.mubr.bf16.mxu0 %v3336_v2  ;;  %v3116_v2 = vld [vmem:[%s4357_s11 + $0x74] ss:$8 sps:$4 sm:$0xff]  }
 0x57b   :  { %1541 = vmatprep.subr.bf16.mxu0 %v3116_v2  ;;  %v3141_v2 = vld [vmem:[%s4358_s12 + $0x190] ss:$28 sps:$4 sm:$0xff]  }
 0x57c   :  { %1542 = vmatpush1.bf16.msra.mxu0 %v3114_v56 }
 0x57d   :  { %1543 = vmatprep.subr.bf16.mxu0 %v3119_v57 }
 0x580   :  { %1544 = vmatpush1.bf16.msra.mxu0 %v3117_v3  ;;  %v3149_v3 = vld [vmem:[%s4358_s12 + $0x15c] ss:$28 sps:$4 sm:$0xff]  }
 0x581   :  { %1545 = vmatprep.subr.bf16.mxu0 %v3122_v58 }
 0x584   :  { %1546 = vmatpush1.bf16.msra.mxu0 %v3120_v59  ;;  %v3153_v59 = vld [vmem:[%s4358_s12 + $0x120] ss:$28 sps:$4 sm:$0xff]  }
 0x585   :  { %1547 = vmatprep.subr.bf16.mxu0 %v3125_v60  ;;  %v3161_v60 = vld [vmem:[%s4358_s12 + $0xec] ss:$28 sps:$4 sm:$0xff]  }
 0x588   :  { %1548 = vmatpush1.bf16.msra.mxu0 %v3123_v61  ;;  %v3159_v61 = vld [vmem:[%s4358_s12 + $0xe8] ss:$28 sps:$4 sm:$0xff]  }
 0x589   :  { %1549 = vmatprep.subr.bf16.mxu0 %v3128_v62  ;;  %v3167_v62 = vld [vmem:[%s4358_s12 + $0xb4] ss:$28 sps:$4 sm:$0xff]  }
 0x58c   :  { %1550 = vmatpush1.bf16.msra.mxu0 %v3126_v63  ;;  %v3165_v63 = vld [vmem:[%s4358_s12 + $0xb0] ss:$28 sps:$4 sm:$0xff]  }
 0x58d   :  { %1551 = vmatprep.subr.bf16.mxu0 %v3131_v0  ;;  %v3173_v0 = vld [vmem:[%s4358_s12 + $0x7c] ss:$28 sps:$4 sm:$0xff]  }
 0x590   :  { %1552 = vmatpush1.bf16.msra.mxu0 %v3129_v1  ;;  %v3171_v1 = vld [vmem:[%s4358_s12 + $0x78] ss:$28 sps:$4 sm:$0xff]  }
 0x591   :  { %1553 = vmatprep.subr.bf16.mxu0 %v3134_v4  ;;  %v3179_v4 = vld [vmem:[%s4358_s12 + $0x44] ss:$28 sps:$4 sm:$0xff]  }
 0x594   :  { %1554 = vmatpush1.bf16.msra.mxu0 %v3132_v5  ;;  %v3177_v5 = vld [vmem:[%s4358_s12 + $0x40] ss:$28 sps:$4 sm:$0xff]  }
 0x595   :  { %1555 = vmatprep.subr.bf16.mxu0 %v3137_v15  ;;  %v3207_v15 = vld [vmem:[%s4358_s12 + $0x2a8] ss:$28 sps:$4 sm:$0xff]  }
 0x598   :  { %1556 = vmatpush1.bf16.msra.mxu0 %v3135_v16  ;;  %v3215_v16 = vld [vmem:[%s4358_s12 + $0x274] ss:$28 sps:$4 sm:$0xff]  }
 0x599   :  { %2359 = vmatprep.subr.bf16.mxu0 %v3143_v22  ;;  %v3219_v22 = vld [vmem:[%s4358_s12 + $0x238] ss:$28 sps:$4 sm:$0xff]  }
 0x639   :  { %v1348_v8 = vpop.f32.mrf.mxu0 }
 0x63a   :  { %v1349_v9 = vadd.f32 %v1348_v8, %v1304_v7  ;;  %v3183_v7 = vld [vmem:[%s4358_s12 + $0x8] ss:$28 sps:$4 sm:$0xff]   ;;  %v3191_v8 = vld [vmem:[%s4358_s12 + $0x354] ss:$28 sps:$4 sm:$0xff]  }
 0x63b   :  { %v2910_v10 = vpop.f32.mrf.mxu0 }
 0x63c   :  { %v1354_v11 = vmax.f32 %v1349_v9, 0.0  ;;  %v3189_v9 = vld [vmem:[%s4358_s12 + $0x350] ss:$28 sps:$4 sm:$0xff]   ;;  %v3197_v10 = vld [vmem:[%s4358_s12 + $0x31c] ss:$28 sps:$4 sm:$0xff]  }
 0x63d   :  { %v1351_v12 = vpop.f32.mrf.mxu0 }
 0x63e   :  { %v1355_v13 = vpack.c.bf16 %v1354_v11, %v1354_v11  ;;  %v3195_v11 = vld [vmem:[%s4358_s12 + $0x318] ss:$28 sps:$4 sm:$0xff]   ;;  %v3203_v12 = vld [vmem:[%s4358_s12 + $0x2e4] ss:$28 sps:$4 sm:$0xff]  }
 0x63f   :  { %v2911_v14 = vpop.f32.mrf.mxu0 }
 0x640   :  { %2921 = vmatmul.mubr.msk.bf16.vlgmr.msra.gmra.mxu1 %vm1159_vm2, %v1355_v13  ;;  %v3201_v13 = vld [vmem:[%s4358_s12 + $0x2e0] ss:$28 sps:$4 sm:$0xff]   ;;  %v3209_v14 = vld [vmem:[%s4358_s12 + $0x2ac] ss:$28 sps:$4 sm:$0xff]  }
 0x641   :  { %2319 = vmatpush1.bf16.msra.mxu1 %v3138_v20  ;;  %v3213_v20 = vld [vmem:[%s4358_s12 + $0x270] ss:$28 sps:$4 sm:$0xff]  }
 0x642   :  { %2320 = vmatprep.subr.bf16.mxu1 %v3146_v23  ;;  %v3224_v23 = vld [vmem:[%s4358_s12 + $0x1fc] ss:$28 sps:$4 sm:$0xff]  }
 0x645   :  { %2321 = vmatpush1.bf16.msra.mxu1 %v3144_v24  ;;  %v3227_v24 = vld [vmem:[%s4358_s12 + $0x204] ss:$28 sps:$4 sm:$0xff]  }
 0x646   :  { %2322 = vmatprep.subr.bf16.mxu1 %v3152_v25  ;;  %v3222_v25 = vld [vmem:[%s4358_s12 + $0x1f8] ss:$28 sps:$4 sm:$0xff]  }
 0x649   :  { %2323 = vmatpush1.bf16.msra.mxu1 %v3150_v26  ;;  %v3225_v26 = vld [vmem:[%s4358_s12 + $0x200] ss:$28 sps:$4 sm:$0xff]  }
 0x64a   :  { %2324 = vmatprep.subr.bf16.mxu1 %v3158_v27  ;;  %v3230_v27 = vld [vmem:[%s4358_s12 + $0x1c4] ss:$28 sps:$4 sm:$0xff]  }
 0x64d   :  { %2325 = vmatpush1.bf16.msra.mxu1 %v3156_v28  ;;  %v3233_v28 = vld [vmem:[%s4358_s12 + $0x1cc] ss:$28 sps:$4 sm:$0xff]  }
 0x64e   :  { %2326 = vmatprep.subr.bf16.mxu1 %v3164_v29  ;;  %v3228_v29 = vld [vmem:[%s4358_s12 + $0x1c0] ss:$28 sps:$4 sm:$0xff]  }
 0x651   :  { %2327 = vmatpush1.bf16.msra.mxu1 %v3162_v30  ;;  %v3231_v30 = vld [vmem:[%s4358_s12 + $0x1c8] ss:$28 sps:$4 sm:$0xff]  }
 0x652   :  { %2328 = vmatprep.subr.bf16.mxu1 %v3170_v31  ;;  %v3236_v31 = vld [vmem:[%s4358_s12 + $0x19c] ss:$28 sps:$4 sm:$0xff]  }
 0x655   :  { %2329 = vmatpush1.bf16.msra.mxu1 %v3168_v32  ;;  %v3237_v32 = vld [vmem:[%s4358_s12 + $0x360] ss:$28 sps:$4 sm:$0xff]  }
 0x656   :  { %2330 = vmatprep.subr.bf16.mxu1 %v3176_v33  ;;  %v4163_v33 = vld [vmem:[%s4348_s2 + $0x38] sm:$0x3] }
 0x659   :  { %2331 = vmatpush1.bf16.msra.mxu1 %v3174_v34  ;;  %v4168_v34 = vld [vmem:[%s4348_s2 + $0x40] sm:$0x3] }
 0x65a   :  { %2332 = vmatprep.subr.bf16.mxu1 %v3182_v35  ;;  %v1456_v35 = vrot.slane %v4163_v33, %v3788_v18 }
 0x65d   :  { %2333 = vmatpush1.bf16.msra.mxu1 %v3180_v36  ;;  %v1460_v36 = vrot.slane %v4168_v34, %v3788_v18  ;;  %v3241_v18 = vld [vmem:[%s4358_s12 + $0x164] ss:$28 sps:$4 sm:$0xff]  }
 0x65e   :  { %2334 = vmatprep.subr.bf16.mxu1 %v3188_v37 }
 0x661   :  { %2335 = vmatpush2.bf16.msra.mxu1 %v3186_v38 }
 0x662   :  { %2336 = vmatprep.subr.bf16.mxu1 %v3194_v39 }
 0x665   :  { %2337 = vmatpush2.bf16.msra.mxu1 %v3192_v40 }
 0x666   :  { %2338 = vmatprep.subr.bf16.mxu1 %v3200_v41 }
 0x669   :  { %2339 = vmatpush2.bf16.msra.mxu1 %v3198_v42 }
 0x66a   :  { %2340 = vmatprep.subr.bf16.mxu1 %v3206_v43 }
 0x66d   :  { %2341 = vmatpush2.bf16.msra.mxu1 %v3204_v44 }
 0x66e   :  { %2342 = vmatprep.subr.bf16.mxu1 %v3212_v45 }
 0x671   :  { %2343 = vmatpush2.bf16.msra.mxu1 %v3210_v46  ;;  %v3234_v46 = vld [vmem:[%s4358_s12 + $0x198] ss:$28 sps:$4 sm:$0xff]  }
 0x672   :  { %2344 = vmatprep.subr.bf16.mxu1 %v3218_v47  ;;  %v3238_v47 = vld [vmem:[%s4358_s12 + $0x1a0] ss:$28 sps:$4 sm:$0xff]  }
 0x675   :  { %2345 = vmatpush2.bf16.msra.mxu1 %v3216_v48 }
 0x676   :  { %2346 = vmatprep.subr.bf16.mxu1 %v3224_v23  ;;  %v3286_v23 = vld [vmem:[%s4358_s12 + $0x278] ss:$28 sps:$4 sm:$0xff]  }
 0x679   :  { %2347 = vmatpush2.bf16.msra.mxu1 %v3222_v25  ;;  %v3289_v25 = vld [vmem:[%s4358_s12 + $0x240] ss:$28 sps:$4 sm:$0xff]  }
 0x67a   :  { %2348 = vmatprep.subr.bf16.mxu1 %v3230_v27  ;;  %v3292_v27 = vld [vmem:[%s4358_s12 + $0x208] ss:$28 sps:$4 sm:$0xff]  }
 0x67d   :  { %2349 = vmatpush2.bf16.msra.mxu1 %v3228_v29  ;;  %v3295_v29 = vld [vmem:[%s4358_s12 + $0x1d0] ss:$28 sps:$4 sm:$0xff]  }
 0x67e   :  { %2400 = vmatprep.subr.bf16.mxu1 %v3236_v31  ;;  %v53_v31 = vld [vmem:[%s4348_s2 + $0x50] sm:$0x3] }
 0x700   :  { %v1429_v52 = vpop.f32.mrf.mxu1 }
 0x701   :  { %v1430_v53 = vadd.f32 %v1429_v52, %v1367_v51  ;;  %v3239_v51 = vld [vmem:[%s4358_s12 + $0x160] ss:$28 sps:$4 sm:$0xff]   ;;  %v3243_v52 = vld [vmem:[%s4358_s12 + $0x168] ss:$28 sps:$4 sm:$0xff]  }
 0x702   :  { %v2922_v54 = vpop.f32.mrf.mxu1 }
 0x703   :  { %v1435_v55 = vmax.f32 %v1430_v53, 0.0  ;;  %v3246_v53 = vld [vmem:[%s4358_s12 + $0x12c] ss:$28 sps:$4 sm:$0xff]  }
 0x704   :  { %v1432_v56 = vpop.f32.mrf.mxu1  ;;  %v3247_v54 = vld [vmem:[%s4358_s12 + $0x2f0] ss:$28 sps:$4 sm:$0xff]  }
 0x705   :  { %v1436_v57 = vpack.c.bf16 %v1435_v55, %v1435_v55  ;;  %v3244_v55 = vld [vmem:[%s4358_s12 + $0x128] ss:$28 sps:$4 sm:$0xff]   ;;  %v3248_v56 = vld [vmem:[%s4358_s12 + $0x130] ss:$28 sps:$4 sm:$0xff]  }
 0x706   :  { %v2923_v58 = vpop.f32.mrf.mxu1 }
 0x707   :  { %1574 = vmatmul.mubr.bf16.vlgmr.msra.gmra.mxu0 %v1436_v57  ;;  %v3252_v57 = vld [vmem:[%s4358_s12 + $0x2b8] ss:$28 sps:$4 sm:$0xff]  }
 0x708   :  { %2360 = vmatpush1.bf16.msra.mxu0 %v3141_v2  ;;  %v3251_v2 = vld [vmem:[%s4358_s12 + $0xf4] ss:$28 sps:$4 sm:$0xff]  }
 0x709   :  { %2361 = vmatprep.subr.bf16.mxu0 %v3149_v3  ;;  %v3249_v3 = vld [vmem:[%s4358_s12 + $0xf0] ss:$28 sps:$4 sm:$0xff]   ;;  %v3253_v58 = vld [vmem:[%s4358_s12 + $0xf8] ss:$28 sps:$4 sm:$0xff]  }
 0x70c   :  { %2362 = vmatpush1.bf16.msra.mxu0 %v3147_v17  ;;  %v3256_v17 = vld [vmem:[%s4358_s12 + $0xbc] ss:$28 sps:$4 sm:$0xff]  }
 0x70d   :  { %2363 = vmatprep.subr.bf16.mxu0 %v3155_v19  ;;  %v3257_v19 = vld [vmem:[%s4358_s12 + $0x280] ss:$28 sps:$4 sm:$0xff]  }
 0x710   :  { %2364 = vmatpush1.bf16.msra.mxu0 %v3153_v59  ;;  %v3254_v59 = vld [vmem:[%s4358_s12 + $0xb8] ss:$28 sps:$4 sm:$0xff]  }
 0x711   :  { %2365 = vmatprep.subr.bf16.mxu0 %v3161_v60  ;;  %v3258_v60 = vld [vmem:[%s4358_s12 + $0xc0] ss:$28 sps:$4 sm:$0xff]  }
 0x714   :  { %2366 = vmatpush1.bf16.msra.mxu0 %v3159_v61  ;;  %v3261_v61 = vld [vmem:[%s4358_s12 + $0x84] ss:$28 sps:$4 sm:$0xff]  }
 0x715   :  { %2367 = vmatprep.subr.bf16.mxu0 %v3167_v62  ;;  %v3262_v62 = vld [vmem:[%s4358_s12 + $0x248] ss:$28 sps:$4 sm:$0xff]  }
 0x718   :  { %2368 = vmatpush1.bf16.msra.mxu0 %v3165_v63  ;;  %v3259_v63 = vld [vmem:[%s4358_s12 + $0x80] ss:$28 sps:$4 sm:$0xff]  }
 0x719   :  { %2369 = vmatprep.subr.bf16.mxu0 %v3173_v0  ;;  %v3263_v0 = vld [vmem:[%s4358_s12 + $0x88] ss:$28 sps:$4 sm:$0xff]  }
 0x71c   :  { %2370 = vmatpush1.bf16.msra.mxu0 %v3171_v1  ;;  %v3266_v1 = vld [vmem:[%s4358_s12 + $0x4c] ss:$28 sps:$4 sm:$0xff]  }
 0x71d   :  { %2371 = vmatprep.subr.bf16.mxu0 %v3179_v4  ;;  %v3267_v4 = vld [vmem:[%s4358_s12 + $0x210] ss:$28 sps:$4 sm:$0xff]  }
 0x720   :  { %2372 = vmatpush1.bf16.msra.mxu0 %v3177_v5  ;;  %v3264_v5 = vld [vmem:[%s4358_s12 + $0x48] ss:$28 sps:$4 sm:$0xff]  }
 0x721   :  { %2373 = vmatprep.subr.bf16.mxu0 %v3185_v6  ;;  %v3268_v6 = vld [vmem:[%s4358_s12 + $0x50] ss:$28 sps:$4 sm:$0xff]  }
 0x724   :  { %2374 = vmatpush1.bf16.msra.mxu0 %v3183_v7  ;;  %v3271_v7 = vld [vmem:[%s4358_s12 + $0x14] ss:$28 sps:$4 sm:$0xff]  }
 0x725   :  { %2375 = vmatprep.subr.bf16.mxu0 %v3191_v8  ;;  %v3272_v8 = vld [vmem:[%s4358_s12 + $0x1d8] ss:$28 sps:$4 sm:$0xff]  }
 0x728   :  { %2376 = vmatpush2.bf16.msra.mxu0 %v3189_v9  ;;  %v3269_v9 = vld [vmem:[%s4358_s12 + $0x10] ss:$28 sps:$4 sm:$0xff]  }
 0x729   :  { %2377 = vmatprep.subr.bf16.mxu0 %v3197_v10  ;;  %v3273_v10 = vld [vmem:[%s4358_s12 + $0x18] ss:$28 sps:$4 sm:$0xff]  }
 0x72c   :  { %2378 = vmatpush2.bf16.msra.mxu0 %v3195_v11  ;;  %v3276_v11 = vld [vmem:[%s4358_s12 + $0x35c] ss:$28 sps:$4 sm:$0xff]  }
 0x72d   :  { %2379 = vmatprep.subr.bf16.mxu0 %v3203_v12  ;;  %v3274_v12 = vld [vmem:[%s4358_s12 + $0x358] ss:$28 sps:$4 sm:$0xff]  }
 0x730   :  { %2380 = vmatpush2.bf16.msra.mxu0 %v3201_v13  ;;  %v3279_v13 = vld [vmem:[%s4358_s12 + $0x324] ss:$28 sps:$4 sm:$0xff]  }
 0x731   :  { %2381 = vmatprep.subr.bf16.mxu0 %v3209_v14  ;;  %v3277_v14 = vld [vmem:[%s4358_s12 + $0x320] ss:$28 sps:$4 sm:$0xff]  }
 0x734   :  { %2382 = vmatpush2.bf16.msra.mxu0 %v3207_v15  ;;  %v3282_v15 = vld [vmem:[%s4358_s12 + $0x2ec] ss:$28 sps:$4 sm:$0xff]  }
 0x735   :  { %2383 = vmatprep.subr.bf16.mxu0 %v3215_v16  ;;  %v3280_v16 = vld [vmem:[%s4358_s12 + $0x2e8] ss:$28 sps:$4 sm:$0xff]  }
 0x738   :  { %2384 = vmatpush2.bf16.msra.mxu0 %v3213_v20  ;;  %v3285_v20 = vld [vmem:[%s4358_s12 + $0x2b4] ss:$28 sps:$4 sm:$0xff]  }
 0x739   :  { %2385 = vmatprep.subr.bf16.mxu0 %v3221_v21  ;;  %v3283_v21 = vld [vmem:[%s4358_s12 + $0x2b0] ss:$28 sps:$4 sm:$0xff]  }
 0x73c   :  { %2386 = vmatpush2.bf16.msra.mxu0 %v3219_v22  ;;  %v3288_v22 = vld [vmem:[%s4358_s12 + $0x27c] ss:$28 sps:$4 sm:$0xff]  }
 0x73d   :  { %2387 = vmatprep.subr.bf16.mxu0 %v3227_v24  ;;  %v3291_v24 = vld [vmem:[%s4358_s12 + $0x244] ss:$28 sps:$4 sm:$0xff]  }
 0x740   :  { %2388 = vmatpush2.bf16.msra.mxu0 %v3225_v26  ;;  %v3294_v26 = vld [vmem:[%s4358_s12 + $0x20c] ss:$28 sps:$4 sm:$0xff]  }
 0x741   :  { %2389 = vmatprep.subr.bf16.mxu0 %v3233_v28  ;;  %v3297_v28 = vld [vmem:[%s4358_s12 + $0x1d4] ss:$28 sps:$4 sm:$0xff]  }
 0x744   :  { %2390 = vmatpush2.bf16.msra.mxu0 %v3231_v30  ;;  %v52_v30 = vld [vmem:[%s4348_s2 + $0x48] sm:$0x3] }
 0x745   :  { %2846 = vmatprep.subr.bf16.mxu0 %v3237_v32  ;;  %v1717_v32 = vrot.slane %v4163_v33, %v3846_v49 }
 0x7c7   :  { %v1575_v37 = vpop.f32.mrf.mxu0 }
 0x7c8   :  { %v1576_v38 = vadd.f32 %v1575_v37, %v1456_v35  ;;  %v1725_v35 = vrot.slane %v52_v30, %v3846_v49  ;;  %v1729_v37 = vrot.slane %v53_v31, %v3846_v49 }
 0x7c9   :  { %v1577_v39 = vpop.f32.mrf.mxu0 }
 0x7ca   :  { %v1578_v40 = vadd.f32 %v1577_v39, %v1460_v36  ;;  %v1582_v41 = vmax.f32 %v1576_v38, 0.0  ;;  %v1721_v36 = vrot.slane %v4168_v34, %v3846_v49 }
 0x7cb   :  { %v1579_v42 = vpop.f32.mrf.mxu0 }
 0x7cc   :  { %v1583_v43 = vmax.f32 %v1578_v40, 0.0  ;;  %v4180_v48 = vpack.c.bf16 %v1582_v41, %v1582_v41 }
 0x7cd   :  { %v1580_v44 = vpop.f32.mrf.mxu0 }
 0x7ce   :  { %v1585_v45 = vpack.c.bf16 %v1583_v43, %v1583_v43 }
 0x7d0   :  { %2350 = vmatprep.mubr.bf16.mxu1 %v1585_v45  ;;  %2391 = vmatprep.mubr.bf16.mxu0 %v1585_v45 }
 0x7d1   :  { %2351 = vmatmul.mubr.bf16.vlgmr.msra.gmra.mxu1 %v4180_v48  ;;  %2392 = vmatmul.mubr.bf16.vlgmr.msra.gmra.mxu0 %v4180_v48 }
 0x7d2   :  { %2401 = vmatpush1.bf16.msra.mxu1 %v3234_v46  ;;  %2847 = vmatpush3.bf16.msra.mxu0 %v3238_v47 }
 0x7d3   :  { %2432 = vmatprep.mubr.bf16.mxu1 %v1585_v45  ;;  %2473 = vmatprep.mubr.bf16.mxu0 %v1585_v45 }
 0x7d4   :  { %2402 = vmatprep.subr.bf16.mxu1 %v3241_v18  ;;  %2848 = vmatprep.subr.bf16.mxu0 %v3242_v50 }
 0x7d6   :  { %2403 = vmatpush1.bf16.msra.mxu1 %v3239_v51  ;;  %2849 = vmatpush3.bf16.msra.mxu0 %v3243_v52 }
 0x7d7   :  { %2404 = vmatprep.subr.bf16.mxu1 %v3246_v53  ;;  %2850 = vmatprep.subr.bf16.mxu0 %v3247_v54 }
 0x7da   :  { %2405 = vmatpush1.bf16.msra.mxu1 %v3244_v55  ;;  %2851 = vmatpush3.bf16.msra.mxu0 %v3248_v56 }
 0x7db   :  { %2406 = vmatprep.subr.bf16.mxu1 %v3251_v2  ;;  %2852 = vmatprep.subr.bf16.mxu0 %v3252_v57 }
 0x7de   :  { %2407 = vmatpush1.bf16.msra.mxu1 %v3249_v3  ;;  %2853 = vmatpush3.bf16.msra.mxu0 %v3253_v58 }
 0x7df   :  { %2408 = vmatprep.subr.bf16.mxu1 %v3256_v17  ;;  %2854 = vmatprep.subr.bf16.mxu0 %v3257_v19 }
 0x7e2   :  { %2409 = vmatpush1.bf16.msra.mxu1 %v3254_v59  ;;  %2855 = vmatpush3.bf16.msra.mxu0 %v3258_v60  ;;  %v56_v60 = vld [vmem:[%s4348_s2 + $0x68] sm:$0x3] }
 0x7e3   :  { %2410 = vmatprep.subr.bf16.mxu1 %v3261_v61  ;;  %2856 = vmatprep.subr.bf16.mxu0 %v3262_v62  ;;  %v1741_v62 = vrot.slane %v56_v60, %v3846_v49 }
 0x7e6   :  { %2411 = vmatpush1.bf16.msra.mxu1 %v3259_v63  ;;  %2857 = vmatpush3.bf16.msra.mxu0 %v3263_v0 }
 0x7e7   :  { %2412 = vmatprep.subr.bf16.mxu1 %v3266_v1  ;;  %2858 = vmatprep.subr.bf16.mxu0 %v3267_v4 }
 0x7ea   :  { %2413 = vmatpush1.bf16.msra.mxu1 %v3264_v5  ;;  %2859 = vmatpush3.bf16.msra.mxu0 %v3268_v6 }
 0x7eb   :  { %2414 = vmatprep.subr.bf16.mxu1 %v3271_v7  ;;  %2860 = vmatprep.subr.bf16.mxu0 %v3272_v8 }
 0x7ee   :  { %2415 = vmatpush1.bf16.msra.mxu1 %v3269_v9  ;;  %2861 = vmatpush3.bf16.msra.mxu0 %v3273_v10  ;;  %v54_v10 = vld [vmem:[%s4348_s2 + $0x58] sm:$0x3] }
 0x7ef   :  { %2416 = vmatprep.subr.bf16.mxu1 %v3276_v11  ;;  %v55_v11 = vld [vmem:[%s4348_s2 + $0x60] sm:$0x3]  ;;  %s3314_s2 = scalar_lea.vmem %s2525_s23, 896 }
 0x7f0   :  { %p3315_p0 = scmp.ne.s32.totalorder %s2525_s23, %s3314_s2  ;;  %p3320_p2 = scmp.lt.s32.totalorder %s3314_s2, %s3314_s2 }
 0x7f1   :  { %2474 = vmatmul.mubr.bf16.vlgmr.msra.gmra.mxu0 %v4180_v48 }
 0x7f2   :  { %2417 = vmatpush2.bf16.msra.mxu1 %v3274_v12  ;;  %v1733_v12 = vrot.slane %v54_v10, %v3846_v49  ;;  %p3321_p3 = por %p3320_p2, %p3319_p1 }
 0x7f3   :  { %2418 = vmatprep.subr.bf16.mxu1 %v3279_v13  ;;  %v1737_v13 = vrot.slane %v55_v11, %v3846_v49 }
 0x7f4   :  { %p3322_p4 = pnand %p3321_p3, %p3315_p0 }
 0x7f6   :  { %2419 = vmatpush2.bf16.msra.mxu1 %v3277_v14 }
 0x7f7   :  { %2420 = vmatprep.subr.bf16.mxu1 %v3282_v15 }
 0x7fa   :  { %2421 = vmatpush2.bf16.msra.mxu1 %v3280_v16 }
 0x7fb   :  { %2422 = vmatprep.subr.bf16.mxu1 %v3285_v20 }
 0x7fe   :  { %2423 = vmatpush2.bf16.msra.mxu1 %v3283_v21 }
 0x7ff   :  { %2424 = vmatprep.subr.bf16.mxu1 %v3288_v22 }
 0x802   :  { %2425 = vmatpush2.bf16.msra.mxu1 %v3286_v23 }
 0x803   :  { %2426 = vmatprep.subr.bf16.mxu1 %v3291_v24 }
 0x806   :  { %2427 = vmatpush2.bf16.msra.mxu1 %v3289_v25 }
 0x807   :  { %2428 = vmatprep.subr.bf16.mxu1 %v3294_v26 }
 0x80a   :  { %2429 = vmatpush2.bf16.msra.mxu1 %v3292_v27 }
 0x80b   :  { %2430 = vmatprep.subr.bf16.mxu1 %v3297_v28 }
 0x80e   :  { %2431 = vmatpush2.bf16.msra.mxu1 %v3295_v29 }
 0x811   :  { %2433 = vmatmul.mubr.bf16.vlgmr.msra.gmra.mxu1 %v4180_v48 }
 0x891   :  { %v2352_v38 = vpop.f32.mrf.mxu1  ;;  %v2393_v39 = vpop.f32.mrf.mxu0 }
 0x892   :  { %v2353_v40 = vadd.f32 %v2352_v38, %v1717_v32  ;;  %v2394_v41 = vadd.f32 %v2393_v39, %v1725_v35 }
 0x893   :  { %v2354_v42 = vpop.f32.mrf.mxu1  ;;  %v2395_v43 = vpop.f32.mrf.mxu0 }
 0x894   :  { %v2481_v44 = vmul.f32 0.5, %v2353_v40  ;;  %v2483_v45 = vmul.f32 0.5, %v2394_v41  ;;  %v2355_v46 = vadd.f32 %v2354_v42, %v1721_v36  ;;  %v2396_v47 = vadd.f32 %v2395_v43, %v1729_v37 }
 0x895   :  { %v2356_v48 = vpop.f32.mrf.mxu1  ;;  %v2397_v18 = vpop.f32.mrf.mxu0 }
 0x896   :  { %3300 = vtanh.f32 %v2481_v44  ;;  %v2482_v33 = vmul.f32 0.5, %v2355_v46  ;;  %v2484_v50 = vmul.f32 0.5, %v2396_v47 }
 0x897   :  { %3302 = vtanh.f32 %v2483_v45  ;;  %v2357_v51 = vpop.f32.mrf.mxu1  ;;  %v2398_v34 = vpop.f32.mrf.mxu0 }
 0x898   :  { %3304 = vtanh.f32 %v2482_v33 }
 0x899   :  { %3306 = vtanh.f32 %v2484_v50 }
 0x8a3   :  { %v3301_v52 = vpop.eup %3300 }
 0x8a4   :  { %v3303_v53 = vpop.eup %3302  ;;  %v2495_v54 = vadd.f32 1.0, %v3301_v52 }
 0x8a5   :  { %v3305_v55 = vpop.eup %3304  ;;  %v2497_v56 = vadd.f32 1.0, %v3303_v53 }
 0x8a6   :  { %v3307_v2 = vpop.eup %3306  ;;  %v2502_v57 = vmul.f32 0.5, %v2495_v54  ;;  %v2496_v3 = vadd.f32 1.0, %v3305_v55 }
 0x8a7   :  { %v2504_v58 = vmul.f32 0.5, %v2497_v56  ;;  %v2498_v17 = vadd.f32 1.0, %v3307_v2 }
 0x8a8   :  { %2509 = vst [vmem:[#allocation2] sm:$0xff] %v2502_v57  ;;  %v2503_v19 = vmul.f32 0.5, %v2496_v3 }
 0x8a9   :  { %2511 = vst [vmem:[#allocation2 + $0x10] sm:$0xff] %v2504_v58  ;;  %v2505_v59 = vmul.f32 0.5, %v2498_v17 }
 0x8aa   :  { %2510 = vst [vmem:[#allocation2 + $0x8] sm:$0xff] %v2503_v19 }
 0x8ab   :  { %2512 = vst [vmem:[#allocation2 + $0x18] sm:$0xff] %v2505_v59 }
 0x8b1   :  { %v2862_v61 = vpop.f32.mrf.mxu0 }
 0x8b3   :  { %v2863_v63 = vpop.f32.mrf.mxu0 }
 0x8b4   :  { %v2864_v0 = vadd.f32 %v2863_v63, %v2862_v61 }
 0x8b5   :  { %v2865_v1 = vpop.f32.mrf.mxu0 }
 0x8b6   :  { %v2476_v4 = vadd.f32 %v2864_v0, %v1741_v62 }
 0x8b7   :  { %v2866_v5 = vpop.f32.mrf.mxu0 }
 0x8b8   :  { %v2487_v6 = vmul.f32 0.5, %v2476_v4 }
 0x8ba   :  { %3308 = vtanh.f32 %v2487_v6 }
 0x8c7   :  { %v3309_v7 = vpop.eup %3308 }
 0x8c8   :  { %v2501_v8 = vadd.f32 1.0, %v3309_v7 }
 0x8ca   :  { %v2508_v9 = vmul.f32 0.5, %v2501_v8 }
 0x8cc   :  { %2515 = vst.msk [vmem:[#allocation2 + $0x30] sm:$0xff] %vm667_vm0, %v2508_v9 }
 0x8d1   :  { %v2434_v14 = vpop.f32.mrf.mxu1 }
 0x8d2   :  { %v2435_v15 = vadd.f32 %v2434_v14, %v1733_v12 }
 0x8d3   :  { %v2436_v16 = vpop.f32.mrf.mxu1 }
 0x8d4   :  { %v2485_v20 = vmul.f32 0.5, %v2435_v15  ;;  %v2437_v21 = vadd.f32 %v2436_v16, %v1737_v13 }
 0x8d5   :  { %v2438_v22 = vpop.f32.mrf.mxu1 }
 0x8d6   :  { %3310 = vtanh.f32 %v2485_v20  ;;  %v2486_v23 = vmul.f32 0.5, %v2437_v21 }
 0x8d7   :  { %v2439_v24 = vpop.f32.mrf.mxu1 }
 0x8d8   :  { %3312 = vtanh.f32 %v2486_v23 }
 0x8e3   :  { %v3311_v25 = vpop.eup %3310 }
 0x8e4   :  { %v2499_v26 = vadd.f32 1.0, %v3311_v25 }
 0x8e5   :  { %v3313_v27 = vpop.eup %3312 }
 0x8e6   :  { %v2506_v28 = vmul.f32 0.5, %v2499_v26  ;;  %v2500_v29 = vadd.f32 1.0, %v3313_v27 }
 0x8e8   :  { %2513 = vst [vmem:[#allocation2 + $0x20] sm:$0xff] %v2506_v28  ;;  %v2507_v30 = vmul.f32 0.5, %v2500_v29 }
 0x8ea   :  { %2514 = vst [vmem:[#allocation2 + $0x28] sm:$0xff] %v2507_v30 }
 0x8eb   :  { %3325 = shalt.err (!%p3322_p4)
}
 0x8ec   :  { %2527 = dma.vmem_to_hbm [thread:$0]  %s2525_s23, 896, %s4359_s13, [#allocation3]  }
 0x8ed   :  { %3334 = dma.done.wait [#allocation3], 896  }
 0x8ee   :  { %3335 = vsyncadd [#allocation3], 4294966400 }
 0x8ef   :  { %2535 = vsyncpa [#allocation3], 1 }

</bundles_post_ra>
